<compile_context>
chip_gen: v6e
topology: v6e:2x2x1
jax: 0.10.0
libtpu: 0.0.40
codegen_flags: <defaults>
</compile_context>

<pallas_src>
import math

import jax
import jax.numpy as jnp
from jax import lax
from jax.experimental import pallas as pl
from jax.experimental.pallas import tpu as pltpu


# ---------------------------------------------------------------------------
# Kernel
# ---------------------------------------------------------------------------

def _make_attention_kernel(num_dimensions: int, se: int, se_pad: int):
    inv_sqrt_d = 1.0 / math.sqrt(num_dimensions)

    def kernel(q_ref, k_ref, mask_ref, w1t_ref, w2t_ref, b_ref,
               out_ref, attn_ref):
        # q_ref:    (tq, D)       f32  decoder rows for this (batch, q-tile)
        # k_ref:    (Se_pad, D)   bf16 encoder rows (zero-padded) for this batch
        # mask_ref: (tq, 1)       f32  decoder mask rows
        # w1t_ref:  (D, D)        bf16 W[:, :D].T   (pre-transposed, wrapper)
        # w2t_ref:  (D, D)        bf16 W[:, D:].T   (pre-transposed, wrapper)
        # b_ref:    (1, D)        f32  Linear bias
        q = q_ref[...]
        k = k_ref[...]

        # scores = (Q / sqrt(D)) @ K^T : fold the scale into the bf16 cast of Q
        # and contract the LAST dims of both operands (no XLU transpose).
        q_scaled = (q * inv_sqrt_d).astype(jnp.bfloat16)
        scores = lax.dot_general(
            q_scaled, k, (((1,), (1,)), ((), ())),
            preferred_element_type=jnp.float32)                    # (tq, Se_pad)

        if se_pad != se:
            # Zero-padded K rows would corrupt the softmax -> mask them out.
            col = lax.broadcasted_iota(jnp.int32, scores.shape, 1)
            scores = jnp.where(col < se, scores, jnp.float32(-1e30))

        # softmax over the encoder axis (dim=2 in the PyTorch module)
        m = jnp.max(scores, axis=-1, keepdims=True)
        e = jnp.exp(scores - m)
        denom = jnp.sum(e, axis=-1, keepdims=True)
        # Exact reciprocal: the attention weights are returned to the caller.
        attn = e * (1.0 / denom)                                   # (tq, Se_pad)

        # attention context (bf16 MXU, f32 accumulate); padded attn cols are 0.
        ctx = jnp.dot(attn.astype(jnp.bfloat16), k,
                      preferred_element_type=jnp.float32)          # (tq, D)

        # Linear(cat([q, ctx])) == q @ W1^T + ctx @ W2^T + b (weights already
        # transposed + bf16, so these are plain bf16 MXU matmuls).
        lin = (jnp.dot(q.astype(jnp.bfloat16), w1t_ref[...],
                       preferred_element_type=jnp.float32)
               + jnp.dot(ctx.astype(jnp.bfloat16), w2t_ref[...],
                         preferred_element_type=jnp.float32)
               + b_ref[...])

        out_ref[...] = (jnp.tanh(lin) * mask_ref[...]).astype(out_ref.dtype)
        attn_ref[...] = attn.astype(attn_ref.dtype)

    return kernel


# ---------------------------------------------------------------------------
# Tiling / VMEM budgeting
# ---------------------------------------------------------------------------

def _vmem_budget_bytes():
    """Generation-aware VMEM budget used both for tile selection and as
    vmem_limit_bytes. v5e/v6e have 128 MiB physical VMEM, v7x only 64 MiB:
    take at most half of physical (headroom for compiler scratch) and never
    more than 48 MiB so a v6e-tuned tile cannot oversubscribe v7x."""
    cap = 64 << 20                               # conservative default (v7x)
    try:
        info = pltpu.get_tpu_info()
        cap = int(getattr(info, "vmem_capacity_bytes", cap)) or cap
    except Exception:
        pass
    return max(16 << 20, min(cap // 2, 48 << 20))


def _choose_q_tile(Sd, Se_pad, D, B, budget_bytes):
    """Largest q-tile (multiple of 8 dividing Sd) whose working set fits the
    budget.  For B==1 keep at least 2 grid steps so the 'parallel' axis can be
    sharded across v7x's two TensorCores."""
    if Sd % 8 != 0:
        return Sd                                # block == full dim is legal
    candidates = [t for t in (1024, 512, 256, 128, 64, 32, 16, 8)
                  if t <= Sd and Sd % t == 0]
    if not candidates:
        return Sd
    if B == 1:
        halved = [t for t in candidates if Sd // t >= 2]
        if halved:
            candidates = halved
    # Resident: K (bf16, double-buffered across batch), weights/bias (bf16/f32,
    # single-buffered via pl.Buffered(1)).
    resident = 2 * (Se_pad * D * 2) + 2 * D * D * 2 + 8 * D * 4
    for t in candidates:
        # q (f32) + mask (f32, lane-padded) + out (f32) + attn (f32), x2 buffers
        per_tile = t * D * 4 + t * 128 * 4 + t * D * 4 + t * Se_pad * 4
        if 2 * per_tile + resident <= budget_bytes:
            return t
    return candidates[-1]


# ---------------------------------------------------------------------------
# Wrapper
# ---------------------------------------------------------------------------

def attention_layer_ref(padded_seqs, encoder_padded_seqs, decoder_mask,
                        weight, bias):
    """Pure-JAX reference mirroring the PyTorch AttentionLayer.forward."""
    D = padded_seqs.shape[-1]
    scores = jnp.einsum('bqd,bkd->bqk', padded_seqs,
                        encoder_padded_seqs) / math.sqrt(D)
    attn = jax.nn.softmax(scores, axis=2)
    ctx = jnp.einsum('bqk,bkd->bqd', attn, encoder_padded_seqs)
    cat = jnp.concatenate([padded_seqs, ctx], axis=2)
    lin = jnp.einsum('bqe,de->bqd', cat, weight) + bias
    return jnp.tanh(lin) * decoder_mask, attn


def attention_layer_pallas(padded_seqs, encoder_padded_seqs, decoder_mask,
                           weight, bias, *, allow_xla_fallback=True):
    """padded_seqs: (B, Sd, D); encoder_padded_seqs: (B, Se, D);
    decoder_mask: (B, Sd, 1); weight: (D, 2D) [nn.Linear]; bias: (D,)."""
    B, Sd, D = padded_seqs.shape
    _, Se, _ = encoder_padded_seqs.shape

    # Tiny shapes: every tile pads to (8,128) vregs and the ~0.35us per-step
    # overhead dominates -> let XLA handle it.
    if allow_xla_fallback and (D < 64 or Sd < 16 or Se < 8):
        return attention_layer_ref(padded_seqs, encoder_padded_seqs,
                                   decoder_mask, weight, bias)

    # Lane-dense attention-weights output: pad Se up to a multiple of 128.
    Se_pad = ((Se + 127) // 128) * 128
    if Se_pad != Se:
        k_in = jnp.pad(encoder_padded_seqs,
                       ((0, 0), (0, Se_pad - Se), (0, 0)))
    else:
        k_in = encoder_padded_seqs
    k_in = k_in.astype(jnp.bfloat16)             # bf16 MXU operand, half DMA

    # Hoist the weight transposes + bf16 cast out of the kernel (one-time XLA).
    w1_t = weight[:, :D].T.astype(jnp.bfloat16)  # (D, D), acts on padded_seqs
    w2_t = weight[:, D:].T.astype(jnp.bfloat16)  # (D, D), acts on context
    b_row = bias.reshape(1, D).astype(jnp.float32)

    budget = _vmem_budget_bytes()
    tq = _choose_q_tile(Sd, Se_pad, D, B, budget)
    n_q = Sd // tq

    kernel = _make_attention_kernel(D, Se, Se_pad)

    out_shapes = (
        jax.ShapeDtypeStruct((B, Sd, D), padded_seqs.dtype),   # attention_masked
        jax.ShapeDtypeStruct((B, Sd, Se_pad), jnp.float32),    # attention_weights
    )

    grid_spec = pltpu.PrefetchScalarGridSpec(
        num_scalar_prefetch=0,
        grid=(B, n_q),
        in_specs=[
            pl.BlockSpec((pl.Squeezed(), tq, D), lambda bi, qi: (bi, qi, 0)),
            pl.BlockSpec((pl.Squeezed(), Se_pad, D), lambda bi, qi: (bi, 0, 0)),
            pl.BlockSpec((pl.Squeezed(), tq, 1), lambda bi, qi: (bi, qi, 0)),
            # Grid-invariant operands: single-buffer to free VMEM.
            pl.BlockSpec((D, D), lambda bi, qi: (0, 0),
                         pipeline_mode=pl.Buffered(1)),
            pl.BlockSpec((D, D), lambda bi, qi: (0, 0),
                         pipeline_mode=pl.Buffered(1)),
            pl.BlockSpec((1, D), lambda bi, qi: (0, 0),
                         pipeline_mode=pl.Buffered(1)),
        ],
        out_specs=[
            pl.BlockSpec((pl.Squeezed(), tq, D), lambda bi, qi: (bi, qi, 0)),
            pl.BlockSpec((pl.Squeezed(), tq, Se_pad), lambda bi, qi: (bi, qi, 0)),
        ],
    )

    # Advisory cost estimate so XLA schedules this custom call sensibly inside
    # the full Decorator graph (GRU/embeddings run in XLA around it).
    flops = (2 * B * Sd * Se_pad * D      # scores
             + 2 * B * Sd * Se_pad * D    # context
             + 4 * B * Sd * D * D)        # linear (two DxD matmuls)
    transcendentals = B * Sd * (Se_pad + D + 1)   # exp + tanh + recip
    bytes_accessed = (B * Sd * D * 4 + B * Se_pad * D * 2 + B * Sd * 4
                      + 2 * D * D * 2 + D * 4
                      + B * Sd * D * 4 + B * Sd * Se_pad * 4)
    cost = pl.CostEstimate(flops=int(flops),
                           transcendentals=int(transcendentals),
                           bytes_accessed=int(bytes_accessed))

    out, attn_pad = pl.pallas_call(
        kernel,
        out_shape=out_shapes,
        grid_spec=grid_spec,
        compiler_params=pltpu.CompilerParams(
            dimension_semantics=("parallel", "parallel"),
            vmem_limit_bytes=budget),
        cost_estimate=cost,
    )(padded_seqs, k_in, decoder_mask, w1_t, w2_t, b_row)

    attn = attn_pad[:, :, :Se] if Se_pad != Se else attn_pad
    return out, attn


# ---------------------------------------------------------------------------
# Self-test
# ---------------------------------------------------------------------------

def _run_case(key, B, Sd, Se, D):
    k1, k2, k3, k4, k5 = jax.random.split(key, 5)
    padded_seqs = jax.random.normal(k1, (B, Sd, D), dtype=jnp.float32)
    encoder_padded_seqs = jax.random.normal(k2, (B, Se, D), dtype=jnp.float32)
    decoder_mask = (jax.random.uniform(k3, (B, Sd, 1)) > 0.2).astype(jnp.float32)

    bound = 1.0 / math.sqrt(2 * D)
    weight = jax.random.uniform(k4, (D, 2 * D), minval=-bound, maxval=bound,
                                dtype=jnp.float32)
    bias = jax.random.uniform(k5, (D,), minval=-bound, maxval=bound,
                              dtype=jnp.float32)

    out, attn = attention_layer_pallas(padded_seqs, encoder_padded_seqs,
                                       decoder_mask, weight, bias)
    jax.block_until_ready((out, attn))

    ref_out, ref_attn = attention_layer_ref(padded_seqs, encoder_padded_seqs,
                                            decoder_mask, weight, bias)
    # bf16 MXU operands (f32 accumulation) -> relaxed tolerances vs f32 ref.
    assert out.shape == ref_out.shape and attn.shape == ref_attn.shape
    assert jnp.allclose(out, ref_out, atol=3e-2, rtol=3e-2), \
        float(jnp.max(jnp.abs(out - ref_out)))
    assert jnp.allclose(attn, ref_attn, atol=3e-2, rtol=3e-2), \
        float(jnp.max(jnp.abs(attn - ref_attn)))


if __name__ == "__main__":
    key = jax.random.PRNGKey(0)
    kA, kB, kC = jax.random.split(key, 3)

    # toy shapes matching the module's small configuration (XLA fallback path)
    _run_case(kA, B=2, Sd=8, Se=8, D=32)
    # Pallas path: tiled decoder axis, Se=96 -> padded+masked to 128 lanes
    _run_case(kB, B=2, Sd=384, Se=96, D=128)
    # Pallas path: B==1 (>=2 parallel grid steps), lane-aligned Se (no mask)
    _run_case(kC, B=1, Sd=256, Se=256, D=128)

    print("KERNEL_OK")
</pallas_src>

<mosaic_0001>
module attributes {stable_mosaic.version = 11 : i64} {
  func.func @kernel(%arg0: i32, %arg1: i32, %arg2: memref<1x128x128xf32, #tpu.memory_space<vmem>>, %arg3: memref<1x128x128xbf16, #tpu.memory_space<vmem>>, %arg4: memref<1x128x1xf32, #tpu.memory_space<vmem>>, %arg5: memref<128x128xbf16, #tpu.memory_space<vmem>>, %arg6: memref<128x128xbf16, #tpu.memory_space<vmem>>, %arg7: memref<1x128xf32, #tpu.memory_space<vmem>>, %arg8: memref<1x128x128xf32, #tpu.memory_space<vmem>>, %arg9: memref<1x128x128xf32, #tpu.memory_space<vmem>>) attributes {dimension_semantics = [#tpu.dimension_semantics<parallel>, #tpu.dimension_semantics<parallel>], iteration_bounds = array<i64: 2, 3>, scalar_prefetch = 0 : i64, scratch_operands = 0 : i64, tpu.core_type = #tpu.core_type<tc>, window_params = [{transform_indices = @transform_0, window_bounds = array<i64: 1, 128, 128>}, {transform_indices = @transform_1, window_bounds = array<i64: 1, 128, 128>}, {transform_indices = @transform_2, window_bounds = array<i64: 1, 128, 1>}, {pipeline_mode = #tpu.pipeline_mode<synchronous>, transform_indices = @transform_3, window_bounds = array<i64: 128, 128>}, {pipeline_mode = #tpu.pipeline_mode<synchronous>, transform_indices = @transform_4, window_bounds = array<i64: 128, 128>}, {pipeline_mode = #tpu.pipeline_mode<synchronous>, transform_indices = @transform_5, window_bounds = array<i64: 1, 128>}, {transform_indices = @transform_6, window_bounds = array<i64: 1, 128, 128>}, {transform_indices = @transform_7, window_bounds = array<i64: 1, 128, 128>}]} {
    %c0 = arith.constant 0 : index
    %c0_0 = arith.constant 0 : index
    %c0_1 = arith.constant 0 : index
    %0 = vector.load %arg2[%c0, %c0_0, %c0_1] : memref<1x128x128xf32, #tpu.memory_space<vmem>>, vector<1x128x128xf32>
    %1 = vector.shape_cast %0 : vector<1x128x128xf32> to vector<128x128xf32>
    %c0_2 = arith.constant 0 : index
    %c0_3 = arith.constant 0 : index
    %c0_4 = arith.constant 0 : index
    %2 = vector.load %arg3[%c0_2, %c0_3, %c0_4] : memref<1x128x128xbf16, #tpu.memory_space<vmem>>, vector<1x128x128xbf16>
    %3 = vector.shape_cast %2 : vector<1x128x128xbf16> to vector<128x128xbf16>
    %cst = arith.constant 0.0883883461 : f32
    %4 = vector.broadcast %cst : f32 to vector<128x128xf32>
    %5 = arith.mulf %1, %4 : vector<128x128xf32>
    %6 = arith.truncf %5 : vector<128x128xf32> to vector<128x128xbf16>
    %cst_5 = arith.constant dense<0.000000e+00> : vector<128x128xf32>
    %7 = tpu.matmul %6, %3, %cst_5 {dimension_numbers = #tpu.dot_dimension_numbers<[1], [1], [0], [0], [0, 0, 1, 0], [], []>} : vector<128x128xbf16>, vector<128x128xbf16>, vector<128x128xf32> -> vector<128x128xf32>
    %8 = tpu.iota {dimensions = array<i32: 1>} : vector<128x128xi32>
    %c96_i32 = arith.constant 96 : i32
    %9 = vector.broadcast %c96_i32 : i32 to vector<128x128xi32>
    %10 = arith.cmpi slt, %8, %9 : vector<128x128xi32>
    %cst_6 = arith.constant -1.000000e+30 : f32
    %11 = vector.broadcast %cst_6 : f32 to vector<128x128xf32>
    %12 = arith.select %10, %7, %11 : vector<128x128xi1>, vector<128x128xf32>
    %cst_7 = arith.constant dense<0xFF800000> : vector<128xf32>
    %13 = vector.multi_reduction <maximumf>, %12, %cst_7 [1] : vector<128x128xf32> to vector<128xf32>
    %14 = vector.shape_cast %13 : vector<128xf32> to vector<128x1xf32>
    %15 = vector.broadcast %14 : vector<128x1xf32> to vector<128x128xf32>
    %16 = arith.subf %12, %15 : vector<128x128xf32>
    %17 = math.exp %16 : vector<128x128xf32>
    %cst_8 = arith.constant dense<0.000000e+00> : vector<128xf32>
    %18 = vector.multi_reduction <add>, %17, %cst_8 [1] : vector<128x128xf32> to vector<128xf32>
    %19 = vector.shape_cast %18 : vector<128xf32> to vector<128x1xf32>
    %cst_9 = arith.constant 1.000000e+00 : f32
    %20 = vector.broadcast %cst_9 : f32 to vector<128x1xf32>
    %21 = arith.divf %20, %19 : vector<128x1xf32>
    %22 = vector.broadcast %21 : vector<128x1xf32> to vector<128x128xf32>
    %23 = arith.mulf %17, %22 : vector<128x128xf32>
    %24 = arith.truncf %23 : vector<128x128xf32> to vector<128x128xbf16>
    %cst_10 = arith.constant dense<0.000000e+00> : vector<128x128xf32>
    %25 = tpu.matmul %24, %3, %cst_10 {dimension_numbers = #tpu.dot_dimension_numbers<[1], [0], [0], [1], [0, 0, 1, 1], [], []>} : vector<128x128xbf16>, vector<128x128xbf16>, vector<128x128xf32> -> vector<128x128xf32>
    %26 = arith.truncf %1 : vector<128x128xf32> to vector<128x128xbf16>
    %c0_11 = arith.constant 0 : index
    %c0_12 = arith.constant 0 : index
    %27 = vector.load %arg5[%c0_11, %c0_12] : memref<128x128xbf16, #tpu.memory_space<vmem>>, vector<128x128xbf16>
    %cst_13 = arith.constant dense<0.000000e+00> : vector<128x128xf32>
    %28 = tpu.matmul %26, %27, %cst_13 {dimension_numbers = #tpu.dot_dimension_numbers<[1], [0], [0], [1], [0, 0, 1, 1], [], []>} : vector<128x128xbf16>, vector<128x128xbf16>, vector<128x128xf32> -> vector<128x128xf32>
    %29 = arith.truncf %25 : vector<128x128xf32> to vector<128x128xbf16>
    %c0_14 = arith.constant 0 : index
    %c0_15 = arith.constant 0 : index
    %30 = vector.load %arg6[%c0_14, %c0_15] : memref<128x128xbf16, #tpu.memory_space<vmem>>, vector<128x128xbf16>
    %cst_16 = arith.constant dense<0.000000e+00> : vector<128x128xf32>
    %31 = tpu.matmul %29, %30, %cst_16 {dimension_numbers = #tpu.dot_dimension_numbers<[1], [0], [0], [1], [0, 0, 1, 1], [], []>} : vector<128x128xbf16>, vector<128x128xbf16>, vector<128x128xf32> -> vector<128x128xf32>
    %32 = arith.addf %28, %31 : vector<128x128xf32>
    %c0_17 = arith.constant 0 : index
    %c0_18 = arith.constant 0 : index
    %33 = vector.load %arg7[%c0_17, %c0_18] : memref<1x128xf32, #tpu.memory_space<vmem>>, vector<1x128xf32>
    %34 = vector.broadcast %33 : vector<1x128xf32> to vector<128x128xf32>
    %35 = arith.addf %32, %34 : vector<128x128xf32>
    %36 = math.tanh %35 : vector<128x128xf32>
    %c0_19 = arith.constant 0 : index
    %c0_20 = arith.constant 0 : index
    %c0_21 = arith.constant 0 : index
    %37 = vector.load %arg4[%c0_19, %c0_20, %c0_21] : memref<1x128x1xf32, #tpu.memory_space<vmem>>, vector<1x128x1xf32>
    %38 = vector.shape_cast %37 : vector<1x128x1xf32> to vector<128x1xf32>
    %39 = vector.broadcast %38 : vector<128x1xf32> to vector<128x128xf32>
    %40 = arith.mulf %36, %39 : vector<128x128xf32>
    %c0_22 = arith.constant 0 : index
    %c0_23 = arith.constant 0 : index
    %c0_24 = arith.constant 0 : index
    %41 = vector.load %arg8[%c0_22, %c0_23, %c0_24] : memref<1x128x128xf32, #tpu.memory_space<vmem>>, vector<1x128x128xf32>
    %42 = vector.shape_cast %41 : vector<1x128x128xf32> to vector<128x128xf32>
    %43 = vector.shape_cast %40 : vector<128x128xf32> to vector<1x128x128xf32>
    tpu.vector_store %arg8[%c0_22, %c0_23, %c0_24], %43 {strides = array<i32>} : memref<1x128x128xf32, #tpu.memory_space<vmem>>, vector<1x128x128xf32>,
    %c0_25 = arith.constant 0 : index
    %c0_26 = arith.constant 0 : index
    %c0_27 = arith.constant 0 : index
    %44 = vector.load %arg9[%c0_25, %c0_26, %c0_27] : memref<1x128x128xf32, #tpu.memory_space<vmem>>, vector<1x128x128xf32>
    %45 = vector.shape_cast %44 : vector<1x128x128xf32> to vector<128x128xf32>
    %46 = vector.shape_cast %23 : vector<128x128xf32> to vector<1x128x128xf32>
    tpu.vector_store %arg9[%c0_25, %c0_26, %c0_27], %46 {strides = array<i32>} : memref<1x128x128xf32, #tpu.memory_space<vmem>>, vector<1x128x128xf32>,
    return
  }
  func.func @transform_0(%arg0: i32, %arg1: i32) -> (i32, i32, i32) {
    %c0_i32 = arith.constant 0 : i32
    %c0_i32_0 = arith.constant 0 : i32
    return %arg0, %arg1, %c0_i32 : i32, i32, i32
  }
  func.func @transform_1(%arg0: i32, %arg1: i32) -> (i32, i32, i32) {
    %c0_i32 = arith.constant 0 : i32
    %c0_i32_0 = arith.constant 0 : i32
    %c0_i32_1 = arith.constant 0 : i32
    return %arg0, %c0_i32, %c0_i32_0 : i32, i32, i32
  }
  func.func @transform_2(%arg0: i32, %arg1: i32) -> (i32, i32, i32) {
    %c0_i32 = arith.constant 0 : i32
    %c0_i32_0 = arith.constant 0 : i32
    return %arg0, %arg1, %c0_i32 : i32, i32, i32
  }
  func.func @transform_3(%arg0: i32, %arg1: i32) -> (i32, i32) {
    %c0_i32 = arith.constant 0 : i32
    %c0_i32_0 = arith.constant 0 : i32
    %c0_i32_1 = arith.constant 0 : i32
    return %c0_i32, %c0_i32_0 : i32, i32
  }
  func.func @transform_4(%arg0: i32, %arg1: i32) -> (i32, i32) {
    %c0_i32 = arith.constant 0 : i32
    %c0_i32_0 = arith.constant 0 : i32
    %c0_i32_1 = arith.constant 0 : i32
    return %c0_i32, %c0_i32_0 : i32, i32
  }
  func.func @transform_5(%arg0: i32, %arg1: i32) -> (i32, i32) {
    %c0_i32 = arith.constant 0 : i32
    %c0_i32_0 = arith.constant 0 : i32
    %c0_i32_1 = arith.constant 0 : i32
    return %c0_i32, %c0_i32_0 : i32, i32
  }
  func.func @transform_6(%arg0: i32, %arg1: i32) -> (i32, i32, i32) {
    %c0_i32 = arith.constant 0 : i32
    %c0_i32_0 = arith.constant 0 : i32
    return %arg0, %arg1, %c0_i32 : i32, i32, i32
  }
  func.func @transform_7(%arg0: i32, %arg1: i32) -> (i32, i32, i32) {
    %c0_i32 = arith.constant 0 : i32
    %c0_i32_0 = arith.constant 0 : i32
    return %arg0, %arg1, %c0_i32 : i32, i32, i32
  }
}

</mosaic_0001>

<bundles_post_ra>
// kernel: tpu_custom_call.1
= control target key start
LH: loop header
LB: loop body
LE: loop exit
PB: predicated region body
PF: predicated region fallthrough
CT: control target
= control target key end

     0   :  { %s3096_s0 = inlined_call_operand.vmem [shape: f32[2,384,128], index: 0, kind: input, shape index: {}]   ;;  %s3097_s1 = inlined_call_operand.hbm [shape: bf16[2,128,128], index: 1, kind: input, shape index: {}]   ;;  %s3098_s2 = inlined_call_operand.vmem [shape: f32[2,384,1], index: 2, kind: input, shape index: {}]   ;;  %s3099_s3 = inlined_call_operand.hbm [shape: bf16[128,128], index: 3, kind: input, shape index: {}]   ;;  %s3100_s4 = inlined_call_operand.hbm [shape: bf16[128,128], index: 4, kind: input, shape index: {}]   ;;  %s3101_s5 = inlined_call_operand.vmem [shape: f32[1,128], index: 5, kind: input, shape index: {}]   ;;  %s3102_s6 = inlined_call_operand.hbm [shape: f32[2,384,128], index: 6, kind: output, shape index: {0}]   ;;  %s3103_s7 = inlined_call_operand.hbm [shape: f32[2,384,128], index: 7, kind: output, shape index: {1}]  }
   0x1   :  { %3114 = sst [smem:[#allocation20_spill]] %s3098_s2 }
   0x2   :  { %3115 = sst [smem:[#allocation21_spill]] %s3099_s3 }
   0x3   :  { %3116 = sst [smem:[#allocation22_spill]] %s3100_s4 }
   0x4   :  { %3117 = sst [smem:[#allocation23_spill]] %s3101_s5 }
   0x5   :  { %3118 = sst [smem:[#allocation24_spill]] %s3102_s6 }
   0x6   :  { %3119 = sst [smem:[#allocation25_spill]] %s3103_s7 }
   0x7   :  { %13 = vsyncpa [#allocation3], 0 }
   0x8   :  { %15 = vsyncpa [#allocation3 + $0x1], 0 }
   0x9   :  { %16 = vsyncpa [#allocation6], 0 }
   0xa   :  { %17 = vsyncpa [#allocation4], 0 }
   0xb   :  { %19 = vsyncpa [#allocation4 + $0x1], 0 }
   0xc   :  { %20 = vsyncpa [#allocation10], 0 }
   0xd   :  { %22 = vsyncpa [#allocation10 + $0x1], 0  ;;  %s2455_s24 = smov 0   ;;  %s2457_s25 = smov 0  }
   0xe   :  { %s2459_s26 = smov 0   ;;  %s2461_s27 = smov 0  }
   0xf   :  { %s2463_s28 = smov 0   ;;  %s2465_s29 = smov 0  }
  0x10   :  { %s2467_s30 = smov 0   ;;  %s2469_s8 = smov 0  }
  0x11   :  { %s2471_s9 = smov 0   ;;  %s2473_s10 = smov 0  }
  0x12   :  { %s2475_s11 = smov 0  }
  0x13 LB: > { %3120 = sst [smem:[#allocation15_spill]] %s2363_s24  ;;  %s1650_s12 = sadd.s32 4294967295, %s2403_s11   ;;  %s2403_s11 = sphi %s2475_s11, %s28_s11   ;;  %s2399_s10 = sphi %s2473_s10, %s3156_s10   ;;  %s2395_s9 = sphi %s2471_s9, %s3155_s9   ;;  %s2391_s8 = sphi %s2469_s8, %s3154_s8   ;;  %s2387_s30 = sphi %s2467_s30, %s3146_s30   ;;  %s2383_s29 = sphi %s2465_s29, %s3153_s29   ;;  %s2379_s28 = sphi %s2463_s28, %s3152_s28   ;;  %s2375_s27 = sphi %s2461_s27, %s3151_s27   ;;  %s2371_s26 = sphi %s2459_s26, %s3150_s26   ;;  %s2367_s25 = sphi %s2457_s25, %s3149_s25   ;;  %s2363_s24 = sphi %s2455_s24, %s3148_s24  }
  0x14   : > { %3121 = sst [smem:[#allocation16_spill]] %s2395_s9  ;;  %s1651_s13 = sadd.s32 4294967294, %s2403_s11  }
  0x15   : > { %p88_p0 = scmp.ne.s32.totalorder %s2379_s28, %s2375_s27  ;;  %p2511_p1 = scmp.eq.s32.totalorder %s1650_s12, 0 }
  0x16   : > { %p204_p2 = scmp.ne.s32.totalorder %s2371_s26, %s2367_s25  ;;  %p205_p4 = scmp.eq.s32.totalorder %s1650_s12, 5 }
  0x17   : > { %p2520_p3 = por %p2511_p1, %p88_p0  ;;  %p210_p5 = scmp.ne.s32.totalorder %s2367_s25, %s2363_s24 }
  0x18   : > { %p211_p6 = scmp.eq.s32.totalorder %s1651_s13, 5  ;;  %p2526_p7 = por %p205_p4, %p204_p2 }
  0x19   : > { %p1652_p8 = scmp.ge.s32.totalorder %s2403_s11, 1  ;;  %p246_p10 = scmp.lt.s32.totalorder %s2403_s11, 7 }
  0x1a   : > { %s3124_s17 = scalar_select %p2526_p7, 1, 0 }
  0x1b   : > { %p2531_p9 = por %p211_p6, %p210_p5  ;;  %p2536_p11 = pnand %p1652_p8, %p246_p10 }
  0x1c   : > { %3125 = sst [smem:[#allocation17_spill]] %s3124_s17  ;;  %s2405_s20 = smov [#allocation5]  }
  0x1d   : > { %s3126_s18 = scalar_select %p2531_p9, 1, 0 }
  0x1e   : > { %s258_s21 = sshll.u32 %s2405_s20, 4  ;;  %p1928_p12 = pneg %p2536_p11  ;;  %s259_s21 = int_to_ptr.vmem [resolvable:$true] %s258_s21 }
  0x1f   : > { %3127 = sst [smem:[#allocation18_spill]] %s3126_s18  ;;  %s2406_s23 = smov [#allocation7]  }
  0x20   : > { %p2544_p13 = pnand %p1928_p12, %p2511_p1  ;;  %s271_s27 = sshll.u32 %s2406_s23, 4  ;;  %s272_s27 = int_to_ptr.vmem [resolvable:$true] %s271_s27 }
  0x21   : > { %s2180_s12 = scalar_lea.vmem %s259_s21, 1024  ;;  %p2188_p6 = scmp.lt.s32.totalorder %s259_s21, %s259_s21 }
  0x22   : > { %p2171_p0 = pneg %p2544_p13  ;;  %p2181_p2 = scmp.ne.s32.totalorder %s259_s21, %s2180_s12 }
  0x23   : > { %p2189_p8 = scmp.lt.s32.totalorder %s2180_s12, %s2180_s12 }
  0x24   : > { %p2183_p4 = pnand %p2181_p2, %p2171_p0 }
  0x25   : > { %p2190_p10 = por %p2189_p8, %p2188_p6 }
  0x26   : > { %p2184_p5 = pneg %p2183_p4 }
  0x28   : > { %p2191_p12 = pnand %p2190_p10, %p2184_p5 }
  0x2a   : > { %2194 = shalt.err (!%p2191_p12)
}
  0x2b   : > { %s3106_s13 = smov 64   ;;  %s3107_s20 = smov 4  }
  0x2c   : > { %s3130_s3 = sld [smem:[#allocation21_spill]]  ;;  %s2206_s18 = scalar_lea.vmem %s272_s27, 1024 }
  0x2d   : > { %p2207_p2 = scmp.ne.s32.totalorder %s272_s27, %s2206_s18  ;;  %p2214_p5 = scmp.lt.s32.totalorder %s272_s27, %s272_s27 }
  0x2e   : > { %p2215_p8 = scmp.lt.s32.totalorder %s2206_s18, %s2206_s18 }
  0x2f   : > { %p2209_p4 = pnand %p2207_p2, %p2171_p0 }
  0x30   : > { %p2216_p10 = por %p2215_p8, %p2214_p5 }
  0x31   : > { %p2210_p6 = pneg %p2209_p4 }
  0x32   : > { %1931 = dma.hbm_to_vmem [thread:$0]  (!%p2544_p13), %s3130_s3, 1024, %s259_s21, [#allocation6], %s3106_s13, %s3106_s13, %s3107_s20  }
  0x33   : > { %p2217_p12 = pnand %p2216_p10, %p2210_p6 }
  0x35   : > { %2220 = shalt.err (!%p2217_p12)
}
  0x36   : > { %s3131_s4 = sld [smem:[#allocation22_spill]]  ;;  %s37_s15 = sadd.s32 1, %s2395_s9 }
  0x37   : > { %s40_s18 = sadd.s32 1, %s2399_s10  ;;  %p38_p0 = scmp.ge.s32.totalorder %s37_s15, 3 }
  0x38   : > { %s75_s21 = sadd.s32 1, %s2383_s29  ;;  %p82_p2 = scmp.ne.s32.totalorder %s2383_s29, %s2379_s28 }
  0x39   : > { %p83_p4 = scmp.eq.s32.totalorder %s2403_s11, 0  ;;  %s3158_s15 = smov (%p38_p0, %s37_s15), 0 }
  0x3a   : > { %3132 = sst [smem:[#allocation19_spill]] %s3158_s15  ;;  %s3160_s18 = smov (!%p38_p0, %s40_s18), %s2399_s10 }
  0x3b   : > { %p2581_p6 = por %p83_p4, %p82_p2  ;;  %s190_s22 = ssub.s32 %s2395_s9, %s3158_s15 }
  0x3c   : > { %1934 = dma.hbm_to_vmem [thread:$0]  (!%p2544_p13), %s3131_s4, 1024, %s272_s27, [#allocation6], %s3106_s13, %s3106_s13, %s3107_s20  }
  0x3d   : > { %p42_p13 = scmp.ge.s32.totalorder %s3160_s18, 2  ;;  %p1948_p5 = scmp.lt.s32.totalorder %s2403_s11, 6 }
  0x3e   : > { %s301_s27 = sand.u32 1, %s2383_s29   ;;  %s1702_s23 = sshll.u32 %s2399_s10, 10 }
  0x3f   : > { %s3162_s18 = smov (%p42_p13, %s3160_s18), 0  ;;  %s1656_s12 = sshll.u32 %s301_s27, 6 }
  0x40   : > { %s72_s13 = ssub.s32 %s2399_s10, %s3162_s18  ;;  %s311_s6 = scalar_lea.hbm %s3097_s1, %s1702_s23 }
  0x41   : > { %p73_p8 = scmp.eq.s32.totalorder %s72_s13, 0  ;;  %s191_s20 = sor.u32 %s190_s22, %s72_s13 }
  0x42   : > { %p192_p10 = scmp.eq.s32.totalorder %s191_s20, 0  ;;  %s3134_s15 = sadd.s32 1, %s2371_s26 }
  0x43   : > { %s2598_s5 = scalar_select %p73_p8, %s2383_s29, %s75_s21  }
  0x44   : > { %s2603_s9 = scalar_select %p192_p10, %s2371_s26, %s3134_s15  }
  0x45   : > { %s305_s7 = scalar_lea.vmem [#allocation2], %s1656_s12  ;;  %p2609_p12 = pnand %p1948_p5, %p2581_p6 }
  0x46   : > { %s312_s17 = sshll.u32 %s305_s7, 4  ;;  %s302_s13 = scalar_lea.sflag [#allocation3], %s301_s27  ;;  %s313_s17 = int_to_ptr.vmem [resolvable:$true] %s312_s17 }
  0x47   : > { %p2223_p0 = pneg %p2609_p12  ;;  %s2234_s3 = scalar_lea.vmem %s313_s17, 1024 }
  0x48   : > { %p2235_p2 = scmp.ne.s32.totalorder %s313_s17, %s2234_s3  ;;  %s2409_s4 = smov [#allocation2]  }
  0x49   : > { %s2239_s20 = sshll.u32 %s2409_s4, 4  ;;  %s2240_s20 = int_to_ptr.vmem [resolvable:$false] %s2239_s20 }
  0x4a   : > { %p2237_p4 = pnand %p2235_p2, %p2223_p0  ;;  %s2241_s15 = scalar_lea.vmem %s2240_s20, 2048 }
  0x4b   : > { %p2242_p8 = scmp.lt.s32.totalorder %s313_s17, %s2240_s20  ;;  %p2243_p10 = scmp.lt.s32.totalorder %s2241_s15, %s2234_s3 }
  0x4c   : > { %p2238_p13 = pneg %p2237_p4 }
  0x4d   : > { %p2244_p9 = por %p2243_p10, %p2242_p8 }
  0x4f   : > { %p2245_p6 = pnand %p2244_p9, %p2238_p13 }
  0x51   : > { %2248 = shalt.err (!%p2245_p6)
}
  0x52   : > { %s3136_s7 = smov 4   ;;  %s3137_s21 = smov 64  }
  0x53   : > { %1938 = dma.hbm_to_vmem [thread:$0]  (!%p2609_p12), %s311_s6, 1024, %s313_s17, %s302_s13, %s3137_s21, %s3137_s21, %s3136_s7  }
  0x54   : > { %337 = sbr.rel (%p2536_p11) target bundleno = 1149 (0x47d), region = 44  ;;  %s339_s24 = sand.u32 (!%p2536_p11), 1, %s2379_s28  }
  0x55   : > { %s1660_s22 = sshll.u32 (!%p2536_p11), %s339_s24, 6  ;;  %s340_s27 = scalar_lea.sflag (!%p2536_p11), [#allocation3], %s339_s24 }
  0x56   : > { %s2623_s23 = scalar_lea.vmem (!%p2536_p11), [#allocation2], %s1660_s22 }
  0x59   : > { %2346 = dma.done.wait (%p2520_p3), %s340_s27, 1024  }
  0x5a   : > { %2348 = vsyncadd (%p2520_p3), %s340_s27, 4294966272 }
  0x5b   : > { %2350 = dma.done.wait (%p2511_p1), [#allocation6], 2048  }
  0x5c   : > { %2352 = vsyncadd (%p2511_p1), [#allocation6], 4294965248  ;;  %s2634_s2 = sshll.u32 %s2387_s30, 4  ;;  %p406_p9 = scmp.lt.s32.totalorder %s2391_s8, 1  ;;  %v2049_v0 = vld [vmem:[%s2623_s23 + $0x38] sm:$0xff]   ;;  %v2050_v1 = vld [vmem:[%s2623_s23 + $0x30] sm:$0xff]   ;;  %v629_v50 = vlaneseq }
  0x5d   : > { %p408_p11 = scmp.lt.s32.totalorder %s2634_s2, 47  ;;  %1767 = vmatprep.subr.bf16.mxu0 %v2049_v0  ;;  %1799 = vmatprep.subr.bf16.mxu1 %v2049_v0  ;;  %v2051_v2 = vld [vmem:[%s2623_s23 + $0x28] sm:$0xff]   ;;  %v2052_v9 = vld [vmem:[%s2623_s23 + $0x20] sm:$0xff]   ;;  %v2053_v14 = vld [vmem:[%s2623_s23 + $0x18] sm:$0xff]   ;;  %s2838_s3 = sand.u32 1, %s2367_s25  }
  0x5e   : > { %s407_s6 = scalar_select %p406_p9, %s2391_s8, 1  ;;  %1768 = vmatpush3.bf16.xpose.msra.mxu0 %v2049_v0  ;;  %1800 = vmatpush3.bf16.msra.mxu1 %v2049_v0  ;;  %v2054_v16 = vld [vmem:[%s2623_s23 + $0x10] sm:$0xff]   ;;  %v2055_v17 = vld [vmem:[%s2623_s23 + $0x8] sm:$0xff]   ;;  %v2056_v18 = vld [vmem:[%s2623_s23] sm:$0xff]   ;;  %v630_v51 = vand.u32 127, %v629_v50 }
  0x5f   : > { %s409_s16 = scalar_select %p408_p11, %s2634_s2, 47  ;;  %1769 = vmatprep.subr.bf16.mxu0 %v2050_v1  ;;  %1801 = vmatprep.subr.bf16.mxu1 %v2050_v1 }
  0x60   : > { %s1911_s17 = smul.u32 48, %s407_s6  ;;  %vm631_vm0 = vcmp.lt.s32.totalorder %v630_v51, 96  ;;  %s1663_s4 = sshll.u32 %s2838_s3, 7 }
  0x61   : > { %s2844_s20 = scalar_lea.vmem [#allocation9], %s1663_s4  ;;  %s3138_s21 = sld [smem:[#allocation20_spill]] }
  0x62   : > { %s2640_s19 = sadd.s32 %s1911_s17, %s409_s16  ;;  %1802 = vmatpush3.bf16.msra.mxu1 %v2050_v1  ;;  %s1912_s27 = smul.u32 48, %s2391_s8 }
  0x63   : > { %s1666_s14 = sshll.u32 %s2640_s19, 3  ;;  %1803 = vmatprep.subr.bf16.mxu1 %v2051_v2  ;;  %s3140_s19 = sld [smem:[#allocation25_spill]] }
  0x64   : > { %s2650_s13 = scalar_lea.vmem %s3096_s0, %s1666_s14  ;;  %s2945_s23 = sadd.s32 %s1912_s27, %s2634_s2 }
  0x65   : > { %v2654_v3 = vld [vmem:[%s2650_s13] sm:$0xff]  ;;  %v2657_v4 = vld [vmem:[%s2650_s13 + $0x8] sm:$0xff]  ;;  %v2662_v7 = vld [vmem:[%s2650_s13 + $0x10] sm:$0xff]  ;;  %s1697_s6 = sshll.u32 %s2945_s23, 7  ;;  %s1473_s30 = sshll.u32 %s2844_s20, 4  ;;  %s2956_s30 = int_to_ptr.vmem [resolvable:$true] %s1473_s30 }
  0x66   : > { %v460_v5 = vmul.f32 0.088388346, %v2654_v3  ;;  %v461_v6 = vmul.f32 0.088388346, %v2657_v4  ;;  %v2665_v8 = vld [vmem:[%s2650_s13 + $0x18] sm:$0xff]  ;;  %1770 = vmatpush3.bf16.xpose.msra.mxu0 %v2050_v1  ;;  %1804 = vmatpush3.bf16.msra.mxu1 %v2051_v2  ;;  %v2671_v12 = vld [vmem:[%s2650_s13 + $0x50] sm:$0xff] }
  0x67   : > { %v914_v10 = vpack.c.bf16 %v2665_v8, %v2662_v7  ;;  %1771 = vmatprep.subr.bf16.mxu0 %v2051_v2  ;;  %1805 = vmatprep.subr.bf16.mxu1 %v2052_v9  ;;  %v2674_v13 = vld [vmem:[%s2650_s13 + $0x58] sm:$0xff]  ;;  %v2683_v19 = vld [vmem:[%s2650_s13 + $0x20] sm:$0xff]  ;;  %v2686_v20 = vld [vmem:[%s2650_s13 + $0x28] sm:$0xff]  ;;  %v462_v21 = vmul.f32 0.088388346, %v2662_v7  ;;  %s2901_s24 = scalar_lea.vmem %s3138_s21, %s1666_s14  ;;  %s1440_s12 = scalar_lea.sflag [#allocation10], %s2838_s3 }
  0x68   : > { %v476_v11 = vpack.c.bf16 %v461_v6, %v460_v5  ;;  %v918_v15 = vpack.c.bf16 %v2674_v13, %v2671_v12  ;;  %v463_v22 = vmul.f32 0.088388346, %v2665_v8  ;;  %v464_v23 = vmul.f32 0.088388346, %v2683_v19  ;;  %v2693_v27 = vld [vmem:[%s2650_s13 + $0x30] sm:$0xff]  ;;  %v2696_v28 = vld [vmem:[%s2650_s13 + $0x38] sm:$0xff] }
  0x69   : > { %v465_v24 = vmul.f32 0.088388346, %v2686_v20  ;;  %v2699_v29 = vld [vmem:[%s2650_s13 + $0x40] sm:$0xff]  ;;  %v2702_v30 = vld [vmem:[%s2650_s13 + $0x48] sm:$0xff]  ;;  %v466_v31 = vmul.f32 0.088388346, %v2693_v27  ;;  %s2953_s14 = scalar_lea.hbm %s3140_s19, %s1697_s6 }
  0x6a   : > { %1783 = vmatprep.mubr.bf16.mxu0 %v476_v11  ;;  %1806 = vmatpush3.bf16.msra.mxu1 %v2052_v9  ;;  %v477_v25 = vpack.c.bf16 %v463_v22, %v462_v21  ;;  %v467_v32 = vmul.f32 0.088388346, %v2696_v28  ;;  %v468_v33 = vmul.f32 0.088388346, %v2699_v29  ;;  %v469_v34 = vmul.f32 0.088388346, %v2702_v30 }
  0x6b   : > { %1807 = vmatprep.subr.bf16.mxu1 %v2053_v14  ;;  %v478_v26 = vpack.c.bf16 %v465_v24, %v464_v23  ;;  %v2709_v37 = vld [vmem:[%s2650_s13 + $0x60] sm:$0xff]  ;;  %v2712_v38 = vld [vmem:[%s2650_s13 + $0x68] sm:$0xff]  ;;  %v470_v39 = vmul.f32 0.088388346, %v2671_v12  ;;  %v471_v40 = vmul.f32 0.088388346, %v2674_v13 }
  0x6c   : > { %v479_v35 = vpack.c.bf16 %v467_v32, %v466_v31  ;;  %v480_v36 = vpack.c.bf16 %v469_v34, %v468_v33  ;;  %v472_v41 = vmul.f32 0.088388346, %v2709_v37  ;;  %v473_v42 = vmul.f32 0.088388346, %v2712_v38  ;;  %v2719_v45 = vld [vmem:[%s2650_s13 + $0x70] sm:$0xff]  ;;  %v2722_v46 = vld [vmem:[%s2650_s13 + $0x78] sm:$0xff] }
  0x6d   : > { %v481_v43 = vpack.c.bf16 %v471_v40, %v470_v39  ;;  %v474_v47 = vmul.f32 0.088388346, %v2719_v45  ;;  %v475_v48 = vmul.f32 0.088388346, %v2722_v46  ;;  %v1292_v7 = vld [vmem:[%s2901_s24 + $0x10] sm:$0xff]  ;;  %v1290_v8 = vld [vmem:[%s2901_s24] sm:$0xff] }
  0x6e   : > { %1772 = vmatpush3.bf16.xpose.msra.mxu0 %v2051_v2  ;;  %1808 = vmatpush3.bf16.msra.mxu1 %v2053_v14  ;;  %v482_v44 = vpack.c.bf16 %v473_v42, %v472_v41  ;;  %s2249_s13 = scalar_lea.vmem %s2956_s30, 2048  ;;  %s2411_s8 = smov [#allocation9]  }
  0x6f   : > { %1773 = vmatprep.subr.bf16.mxu0 %v2052_v9  ;;  %1809 = vmatprep.subr.bf16.mxu1 %v2054_v16  ;;  %v483_v49 = vpack.c.bf16 %v475_v48, %v474_v47  ;;  %p2250_p1 = scmp.ne.s32.totalorder %s2956_s30, %s2249_s13  ;;  %s2253_s2 = sshll.u32 %s2411_s8, 4  ;;  %s2254_s2 = int_to_ptr.vmem [resolvable:$false] %s2253_s2 }
  0x70   : > { %s2255_s15 = scalar_lea.vmem %s2254_s2, 4096  ;;  %p2256_p12 = scmp.lt.s32.totalorder %s2956_s30, %s2254_s2 }
  0x71   : > { %p2251_p3 = pnand %p2250_p1, %p2526_p7  ;;  %p2257_p0 = scmp.lt.s32.totalorder %s2255_s15, %s2249_s13 }
  0x72   : > { %1810 = vmatpush3.bf16.msra.mxu1 %v2054_v16 }
  0x73   : > { %1811 = vmatprep.subr.bf16.mxu1 %v2055_v17  ;;  %p2252_p5 = pneg %p2251_p3  ;;  %p2258_p2 = por %p2257_p0, %p2256_p12 }
  0x75   : > { %p2259_p4 = pnand %p2258_p2, %p2252_p5 }
  0x76   : > { %1774 = vmatpush3.bf16.xpose.msra.mxu0 %v2052_v9  ;;  %1812 = vmatpush3.bf16.msra.mxu1 %v2055_v17 }
  0x77   : > { %1775 = vmatprep.subr.bf16.mxu0 %v2053_v14  ;;  %1813 = vmatprep.subr.bf16.mxu1 %v2056_v18 }
  0x7a   : > { %1814 = vmatpush3.bf16.msra.mxu1 %v2056_v18 }
  0x7e   : > { %1776 = vmatpush3.bf16.xpose.msra.mxu0 %v2053_v14 }
  0x7f   : > { %1777 = vmatprep.subr.bf16.mxu0 %v2054_v16 }
  0x86   : > { %1778 = vmatpush3.bf16.xpose.msra.mxu0 %v2054_v16 }
  0x87   : > { %1779 = vmatprep.subr.bf16.mxu0 %v2055_v17 }
  0x8e   : > { %1780 = vmatpush3.bf16.xpose.msra.mxu0 %v2055_v17 }
  0x8f   : > { %1781 = vmatprep.subr.bf16.mxu0 %v2056_v18 }
  0x96   : > { %1782 = vmatpush3.bf16.xpose.msra.mxu0 %v2056_v18 }
  0x9d   : > { %1784 = vmatmul.mubr.bf16.vlgmr.msra.gmra.mxu0 %v477_v25 }
  0x9e   : > { %1787 = vmatprep.mubr.bf16.mxu0 %v478_v26 }
  0xa5   : > { %1788 = vmatmul.mubr.bf16.gmra.mxu0 %v479_v35 }
  0xa6   : > { %1791 = vmatprep.mubr.bf16.mxu0 %v480_v36 }
  0xad   : > { %1792 = vmatmul.mubr.bf16.gmra.mxu0 %v481_v43 }
  0xae   : > { %1795 = vmatprep.mubr.bf16.mxu0 %v482_v44 }
  0xb5   : > { %1796 = vmatmul.mubr.bf16.gmra.mxu0 %v483_v49 }
 0x15d   : > { %v1785_v52 = vpop.f32.mrf.mxu0 }
 0x15e   : > { %v634_v53 = vsel %vm631_vm0, %v1785_v52, -1e+30 }
 0x15f   : > { %652 = vmax.xlane.f32.xlu1 %v634_v53  ;;  %v566_v54 = vpop.f32.mrf.mxu0 }
 0x160   : > { %v632_v55 = vsel %vm631_vm0, %v566_v54, -1e+30 }
 0x161   : > { %648 = vmax.xlane.f32.xlu0 %v632_v55  ;;  %v1786_v56 = vpop.f32.mrf.mxu0 }
 0x162   : > { %v635_v57 = vsel %vm631_vm0, %v1786_v56, -1e+30 }
 0x163   : > { %654 = vmax.xlane.f32.xlu1 %v635_v57  ;;  %v569_v58 = vpop.f32.mrf.mxu0 }
 0x164   : > { %v633_v59 = vsel %vm631_vm0, %v569_v58, -1e+30 }
 0x165   : > { %650 = vmax.xlane.f32.xlu0 %v633_v59  ;;  %v1789_v60 = vpop.f32.mrf.mxu0 }
 0x166   : > { %v638_v1 = vsel %vm631_vm0, %v1789_v60, -1e+30 }
 0x167   : > { %v582_v61 = vpop.f32.mrf.mxu0 }
 0x168   : > { %v636_v62 = vsel %vm631_vm0, %v582_v61, -1e+30 }
 0x169   : > { %656 = vmax.xlane.f32.xlu0 %v636_v62  ;;  %v1790_v63 = vpop.f32.mrf.mxu0 }
 0x16a   : > { %v639_v9 = vsel %vm631_vm0, %v1790_v63, -1e+30 }
 0x16b   : > { %v585_v0 = vpop.f32.mrf.mxu0 }
 0x16c   : > { %v637_v2 = vsel %vm631_vm0, %v585_v0, -1e+30 }
 0x16d   : > { %660 = vmax.xlane.f32.xlu0 %v638_v1  ;;  %658 = vmax.xlane.f32.xlu1 %v637_v2  ;;  %v1793_v5 = vpop.f32.mrf.mxu0 }
 0x16e   : > { %v642_v17 = vsel %vm631_vm0, %v1793_v5, -1e+30 }
 0x16f   : > { %v598_v6 = vpop.f32.mrf.mxu0 }
 0x170   : > { %v640_v11 = vsel %vm631_vm0, %v598_v6, -1e+30 }
 0x171   : > { %662 = vmax.xlane.f32.xlu1 %v639_v9  ;;  %664 = vmax.xlane.f32.xlu0 %v640_v11  ;;  %v1794_v14 = vpop.f32.mrf.mxu0 }
 0x172   : > { %v2738_v23 = vsel %vm631_vm0, %v1794_v14, -1e+30 }
 0x173   : > { %v601_v16 = vpop.f32.mrf.mxu0 }
 0x174   : > { %v641_v18 = vsel %vm631_vm0, %v601_v16, -1e+30 }
 0x175   : > { %668 = vmax.xlane.f32.xlu0 %v642_v17  ;;  %666 = vmax.xlane.f32.xlu1 %v641_v18  ;;  %v1797_v21 = vpop.f32.mrf.mxu0 }
 0x176   : > { %v2746_v31 = vsel %vm631_vm0, %v1797_v21, -1e+30 }
 0x177   : > { %v614_v22 = vpop.f32.mrf.mxu0 }
 0x178   : > { %v2741_v24 = vsel %vm631_vm0, %v614_v22, -1e+30 }
 0x179   : > { %670 = vmax.xlane.f32.xlu1 %v2738_v23  ;;  %672 = vmax.xlane.f32.xlu0 %v2741_v24  ;;  %v1798_v25 = vpop.f32.mrf.mxu0 }
 0x17a   : > { %v2754_v33 = vsel %vm631_vm0, %v1798_v25, -1e+30 }
 0x17b   : > { %v617_v26 = vpop.f32.mrf.mxu0 }
 0x17c   : > { %v2749_v32 = vsel %vm631_vm0, %v617_v26, -1e+30 }
 0x17d   : > { %676 = vmax.xlane.f32.xlu0 %v2746_v31  ;;  %674 = vmax.xlane.f32.xlu1 %v2749_v32 }
 0x181   : > { %678 = vmax.xlane.f32.xlu1 %v2754_v33 }
 0x1e8   : > { %v653_v34 = vpop.xlane.xlu1 %652 }
 0x1e9   : > { %v682_v35 = vsub.f32 %v634_v53, %v653_v34 }
 0x1ea   : > { %v649_v36 = vpop.xlane.xlu0 %648 }
 0x1eb   : > { %v680_v39 = vsub.f32 %v632_v55, %v649_v36  ;;  %v700_v42 = vmul.f32 1.442695, %v682_v35 }
 0x1ec   : > { %v655_v40 = vpop.xlane.xlu1 %654 }
 0x1ed   : > { %v696_v41 = vmul.f32 1.442695, %v680_v39  ;;  %v683_v43 = vsub.f32 %v635_v57, %v655_v40 }
 0x1ee   : > { %v651_v44 = vpop.xlane.xlu0 %650 }
 0x1ef   : > { %2073 = vpow2.f32 %v696_v41  ;;  %v681_v47 = vsub.f32 %v633_v59, %v651_v44  ;;  %v702_v49 = vmul.f32 1.442695, %v683_v43 }
 0x1f0   : > { %2075 = vpow2.f32 %v700_v42 }
 0x1f1   : > { %v698_v48 = vmul.f32 1.442695, %v681_v47 }
 0x1f2   : > { %v657_v50 = vpop.xlane.xlu0 %656 }
 0x1f3   : > { %2077 = vpow2.f32 %v698_v48  ;;  %v684_v51 = vsub.f32 %v636_v62, %v657_v50 }
 0x1f4   : > { %2079 = vpow2.f32 %v702_v49 }
 0x1f5   : > { %v704_v52 = vmul.f32 1.442695, %v684_v51 }
 0x1f6   : > { %v661_v54 = vpop.xlane.xlu0 %660  ;;  %v659_v56 = vpop.xlane.xlu1 %658 }
 0x1f7   : > { %2081 = vpow2.f32 %v704_v52  ;;  %v686_v53 = vsub.f32 %v638_v1, %v661_v54  ;;  %v685_v55 = vsub.f32 %v637_v2, %v659_v56 }
 0x1f9   : > { %v708_v58 = vmul.f32 1.442695, %v686_v53  ;;  %v706_v60 = vmul.f32 1.442695, %v685_v55  ;;  %v2810_v55 = vld [vmem:[#allocation7 + $0x38] sm:$0xff]  }
 0x1fa   : > { %v663_v61 = vpop.xlane.xlu1 %662  ;;  %v665_v57 = vpop.xlane.xlu0 %664  ;;  %1831 = vmatprep.subr.bf16.mxu1 %v2810_v55 }
 0x1fb   : > { %2083 = vpow2.f32 %v708_v58  ;;  %v687_v63 = vsub.f32 %v639_v9, %v663_v61  ;;  %v688_v59 = vsub.f32 %v640_v11, %v665_v57  ;;  %v2812_v58 = vld [vmem:[#allocation5 + $0x38] sm:$0xff]   ;;  %v2820_v61 = vld [vmem:[#allocation5 + $0x28] sm:$0xff]   ;;  %v2824_v57 = vld [vmem:[#allocation5 + $0x20] sm:$0xff]  }
 0x1fc   : > { %v2757_v0 = vpop.eup %2073  ;;  %2085 = vpow2.f32 %v706_v60  ;;  %v2814_v60 = vld [vmem:[#allocation5 + $0x30] sm:$0xff]   ;;  %1863 = vmatprep.subr.bf16.mxu0 %v2812_v58 }
 0x1fd   : > { %v710_v5 = vmul.f32 1.442695, %v687_v63  ;;  %v712_v6 = vmul.f32 1.442695, %v688_v59  ;;  %728 = vadd.xlane.f32.xlu0 %v2757_v0  ;;  %v2760_v16 = vpop.eup %2075  ;;  %1864 = vmatpush3.bf16.msra.mxu0 %v2812_v58  ;;  %v2828_v63 = vld [vmem:[#allocation5 + $0x18] sm:$0xff]   ;;  %v2832_v59 = vld [vmem:[#allocation5 + $0x10] sm:$0xff]  }
 0x1fe   : > { %v669_v62 = vpop.xlane.xlu0 %668  ;;  %v667_v14 = vpop.xlane.xlu1 %666  ;;  %1865 = vmatprep.subr.bf16.mxu0 %v2814_v60 }
 0x1ff   : > { %2087 = vpow2.f32 %v710_v5  ;;  %v690_v1 = vsub.f32 %v642_v17, %v669_v62  ;;  %v689_v2 = vsub.f32 %v641_v18, %v667_v14 }
 0x200   : > { %v2762_v21 = vpop.eup %2077  ;;  %2089 = vpow2.f32 %v712_v6 }
 0x201   : > { %v716_v22 = vmul.f32 1.442695, %v690_v1  ;;  %v714_v9 = vmul.f32 1.442695, %v689_v2  ;;  %732 = vadd.xlane.f32.xlu0 %v2760_v16  ;;  %730 = vadd.xlane.f32.xlu1 %v2762_v21  ;;  %v2766_v26 = vpop.eup %2079 }
 0x202   : > { %v671_v11 = vpop.xlane.xlu1 %670  ;;  %v673_v25 = vpop.xlane.xlu0 %672  ;;  %1866 = vmatpush3.bf16.msra.mxu0 %v2814_v60 }
 0x203   : > { %2091 = vpow2.f32 %v716_v22  ;;  %v691_v34 = vsub.f32 %v2738_v23, %v671_v11  ;;  %v692_v35 = vsub.f32 %v2741_v24, %v673_v25  ;;  %1867 = vmatprep.subr.bf16.mxu0 %v2820_v61 }
 0x204   : > { %v2770_v17 = vpop.eup %2081  ;;  %2093 = vpow2.f32 %v714_v9 }
 0x205   : > { %v718_v18 = vmul.f32 1.442695, %v691_v34  ;;  %v720_v36 = vmul.f32 1.442695, %v692_v35  ;;  %736 = vadd.xlane.f32.xlu0 %v2770_v17  ;;  %734 = vadd.xlane.f32.xlu1 %v2766_v26 }
 0x206   : > { %v677_v39 = vpop.xlane.xlu0 %676  ;;  %v675_v40 = vpop.xlane.xlu1 %674  ;;  %1868 = vmatpush3.bf16.msra.mxu0 %v2820_v61 }
 0x207   : > { %2095 = vpow2.f32 %v718_v18  ;;  %v694_v41 = vsub.f32 %v2746_v31, %v677_v39  ;;  %v693_v42 = vsub.f32 %v2749_v32, %v675_v40  ;;  %1869 = vmatprep.subr.bf16.mxu0 %v2824_v57 }
 0x208   : > { %v2776_v43 = vpop.eup %2083  ;;  %2097 = vpow2.f32 %v720_v36 }
 0x209   : > { %v2778_v23 = vpop.eup %2085  ;;  %v724_v24 = vmul.f32 1.442695, %v694_v41  ;;  %v722_v44 = vmul.f32 1.442695, %v693_v42  ;;  %740 = vadd.xlane.f32.xlu0 %v2776_v43 }
 0x20a   : > { %738 = vadd.xlane.f32.xlu1 %v2778_v23  ;;  %v679_v47 = vpop.xlane.xlu1 %678  ;;  %1870 = vmatpush3.bf16.msra.mxu0 %v2824_v57 }
 0x20b   : > { %2099 = vpow2.f32 %v724_v24  ;;  %v695_v48 = vsub.f32 %v2754_v33, %v679_v47  ;;  %1871 = vmatprep.subr.bf16.mxu0 %v2828_v63 }
 0x20c   : > { %v2783_v49 = vpop.eup %2087  ;;  %2101 = vpow2.f32 %v722_v44 }
 0x20d   : > { %v2785_v31 = vpop.eup %2089  ;;  %v726_v32 = vmul.f32 1.442695, %v695_v48 }
 0x20e   : > { %744 = vadd.xlane.f32.xlu0 %v2785_v31  ;;  %742 = vadd.xlane.f32.xlu1 %v2783_v49 }
 0x20f   : > { %2103 = vpow2.f32 %v726_v32  ;;  %1872 = vmatpush3.bf16.msra.mxu0 %v2828_v63 }
 0x210   : > { %v2789_v50 = vpop.eup %2091  ;;  %1873 = vmatprep.subr.bf16.mxu0 %v2832_v59 }
 0x211   : > { %v2791_v51 = vpop.eup %2093 }
 0x212   : > { %748 = vadd.xlane.f32.xlu0 %v2789_v50  ;;  %746 = vadd.xlane.f32.xlu1 %v2791_v51 }
 0x213   : > { %1874 = vmatpush3.bf16.msra.mxu0 %v2832_v59 }
 0x214   : > { %v2795_v33 = vpop.eup %2095 }
 0x215   : > { %v2797_v52 = vpop.eup %2097 }
 0x216   : > { %752 = vadd.xlane.f32.xlu0 %v2797_v52  ;;  %750 = vadd.xlane.f32.xlu1 %v2795_v33 }
 0x218   : > { %v2801_v54 = vpop.eup %2099 }
 0x219   : > { %v2803_v56 = vpop.eup %2101 }
 0x21a   : > { %756 = vadd.xlane.f32.xlu0 %v2801_v54  ;;  %754 = vadd.xlane.f32.xlu1 %v2803_v56 }
 0x21c   : > { %v2807_v53 = vpop.eup %2103 }
 0x21e   : > { %758 = vadd.xlane.f32.xlu1 %v2807_v53 }
 0x286   : > { %v729_v5 = vpop.xlane.xlu0 %728 }
 0x287   : > { %2105 = vrcp.f32 %v729_v5  ;;  %v2059_v5 = vld [vmem:[#allocation7 + $0x30] sm:$0xff]  }
 0x28a   : > { %v733_v6 = vpop.xlane.xlu0 %732  ;;  %v731_v62 = vpop.xlane.xlu1 %730 }
 0x28b   : > { %2107 = vrcp.f32 %v733_v6 }
 0x28c   : > { %2109 = vrcp.f32 %v731_v62 }
 0x28e   : > { %v737_v14 = vpop.xlane.xlu0 %736  ;;  %v735_v1 = vpop.xlane.xlu1 %734 }
 0x28f   : > { %2111 = vrcp.f32 %v737_v14 }
 0x290   : > { %2113 = vrcp.f32 %v735_v1 }
 0x292   : > { %v741_v2 = vpop.xlane.xlu0 %740 }
 0x293   : > { %2115 = vrcp.f32 %v741_v2  ;;  %v739_v22 = vpop.xlane.xlu1 %738  ;;  %v2061_v2 = vld [vmem:[#allocation7 + $0x28] sm:$0xff]  }
 0x294   : > { %v2106_v9 = vpop.eup %2105  ;;  %2117 = vrcp.f32 %v739_v22 }
 0x295   : > { %v792_v11 = vmul.f32 %v2106_v9, %v2757_v0 }
 0x297   : > { %v745_v25 = vpop.xlane.xlu0 %744  ;;  %v743_v34 = vpop.xlane.xlu1 %742  ;;  %1418 = vst [vmem:[%s2844_s20] sm:$0xff] %v792_v11 }
 0x298   : > { %v2108_v35 = vpop.eup %2107  ;;  %2119 = vrcp.f32 %v745_v25 }
 0x299   : > { %v2110_v18 = vpop.eup %2109  ;;  %2121 = vrcp.f32 %v743_v34  ;;  %v794_v36 = vmul.f32 %v2108_v35, %v2760_v16  ;;  %v2063_v34 = vld [vmem:[#allocation7 + $0x20] sm:$0xff]  }
 0x29a   : > { %v793_v39 = vmul.f32 %v2110_v18, %v2762_v21 }
 0x29b   : > { %v749_v40 = vpop.xlane.xlu0 %748  ;;  %v747_v0 = vpop.xlane.xlu1 %746  ;;  %1420 = vst [vmem:[%s2844_s20 + $0x10] sm:$0xff] %v794_v36 }
 0x29c   : > { %v2112_v41 = vpop.eup %2111  ;;  %2123 = vrcp.f32 %v749_v40  ;;  %v808_v42 = vpack.c.bf16 %v793_v39, %v792_v11  ;;  %1419 = vst [vmem:[%s2844_s20 + $0x8] sm:$0xff] %v793_v39  ;;  %v2065_v39 = vld [vmem:[#allocation7 + $0x18] sm:$0xff]  }
 0x29d   : > { %v2114_v24 = vpop.eup %2113  ;;  %2125 = vrcp.f32 %v747_v0  ;;  %v796_v44 = vmul.f32 %v2112_v41, %v2770_v17 }
 0x29e   : > { %1815 = vmatprep.mubr.bf16.mxu1 %v808_v42  ;;  %v795_v47 = vmul.f32 %v2114_v24, %v2766_v26  ;;  %v2067_v42 = vld [vmem:[#allocation7 + $0x10] sm:$0xff]  }
 0x29f   : > { %v753_v16 = vpop.xlane.xlu0 %752  ;;  %v751_v48 = vpop.xlane.xlu1 %750  ;;  %1422 = vst [vmem:[%s2844_s20 + $0x20] sm:$0xff] %v796_v44 }
 0x2a0   : > { %v2116_v21 = vpop.eup %2115  ;;  %2127 = vrcp.f32 %v753_v16  ;;  %v809_v32 = vpack.c.bf16 %v795_v47, %v794_v36  ;;  %1421 = vst [vmem:[%s2844_s20 + $0x18] sm:$0xff] %v795_v47 }
 0x2a1   : > { %v2118_v6 = vpop.eup %2117  ;;  %2129 = vrcp.f32 %v751_v48  ;;  %v798_v62 = vmul.f32 %v2116_v21, %v2776_v43  ;;  %v2069_v21 = vld [vmem:[#allocation7 + $0x8] sm:$0xff]  }
 0x2a2   : > { %1816 = vmatmul.mubr.bf16.vlgmr.msra.gmra.mxu1 %v809_v32  ;;  %v797_v17 = vmul.f32 %v2118_v6, %v2778_v23  ;;  %v2878_v32 = vld [vmem:[#allocation5 + $0x8] sm:$0xff]   ;;  %v916_v6 = vpack.c.bf16 %v2696_v28, %v2693_v27  ;;  %v1294_v27 = vld [vmem:[%s2901_s24 + $0x20] sm:$0xff] }
 0x2a3   : > { %v757_v14 = vpop.xlane.xlu0 %756  ;;  %v755_v1 = vpop.xlane.xlu1 %754  ;;  %1424 = vst [vmem:[%s2844_s20 + $0x30] sm:$0xff] %v798_v62  ;;  %1832 = vmatpush3.bf16.msra.mxu1 %v2810_v55  ;;  %1875 = vmatprep.subr.bf16.mxu0 %v2878_v32  ;;  %v1303_v28 = vld [vmem:[%s2901_s24 + $0x68] sm:$0xff] }
 0x2a4   : > { %2131 = vrcp.f32 %v757_v14  ;;  %v810_v26 = vpack.c.bf16 %v797_v17, %v796_v44  ;;  %1423 = vst [vmem:[%s2844_s20 + $0x28] sm:$0xff] %v797_v17  ;;  %1833 = vmatprep.subr.bf16.mxu1 %v2059_v5  ;;  %1876 = vmatpush3.bf16.msra.mxu0 %v2878_v32  ;;  %v1305_v17 = vld [vmem:[%s2901_s24 + $0x78] sm:$0xff]  ;;  %v1296_v14 = vld [vmem:[%s2901_s24 + $0x30] sm:$0xff] }
 0x2a5   : > { %v2120_v22 = vpop.eup %2119  ;;  %2133 = vrcp.f32 %v755_v1  ;;  %v1297_v1 = vld [vmem:[%s2901_s24 + $0x38] sm:$0xff] }
 0x2a6   : > { %v2122_v9 = vpop.eup %2121  ;;  %1819 = vmatprep.mubr.bf16.mxu1 %v810_v26  ;;  %v800_v43 = vmul.f32 %v2120_v22, %v2785_v31  ;;  %v1298_v26 = vld [vmem:[%s2901_s24 + $0x40] sm:$0xff] }
 0x2a7   : > { %v759_v23 = vpop.xlane.xlu1 %758  ;;  %v799_v11 = vmul.f32 %v2122_v9, %v2783_v49  ;;  %1834 = vmatpush3.bf16.msra.mxu1 %v2059_v5  ;;  %v915_v5 = vpack.c.bf16 %v2686_v20, %v2683_v19  ;;  %v1293_v19 = vld [vmem:[%s2901_s24 + $0x18] sm:$0xff]  ;;  %v1302_v22 = vld [vmem:[%s2901_s24 + $0x60] sm:$0xff]  ;;  %v1304_v9 = vld [vmem:[%s2901_s24 + $0x70] sm:$0xff] }
 0x2a8   : > { %2135 = vrcp.f32 %v759_v23  ;;  %1426 = vst [vmem:[%s2844_s20 + $0x40] sm:$0xff] %v800_v43  ;;  %1835 = vmatprep.subr.bf16.mxu1 %v2061_v2  ;;  %v1301_v20 = vld [vmem:[%s2901_s24 + $0x58] sm:$0xff] }
 0x2a9   : > { %v2124_v55 = vpop.eup %2123  ;;  %v811_v25 = vpack.c.bf16 %v799_v11, %v798_v62  ;;  %1425 = vst [vmem:[%s2844_s20 + $0x38] sm:$0xff] %v799_v11  ;;  %v1295_v62 = vld [vmem:[%s2901_s24 + $0x28] sm:$0xff] }
 0x2aa   : > { %v2126_v35 = vpop.eup %2125  ;;  %v802_v18 = vmul.f32 %v2124_v55, %v2789_v50 }
 0x2ab   : > { %1820 = vmatmul.mubr.bf16.gmra.mxu1 %v811_v25  ;;  %v801_v36 = vmul.f32 %v2126_v35, %v2791_v51 }
 0x2ac   : > { %1428 = vst [vmem:[%s2844_s20 + $0x50] sm:$0xff] %v802_v18  ;;  %1836 = vmatpush3.bf16.msra.mxu1 %v2061_v2  ;;  %v1300_v2 = vld [vmem:[%s2901_s24 + $0x50] sm:$0xff] }
 0x2ad   : > { %v2128_v49 = vpop.eup %2127  ;;  %v812_v31 = vpack.c.bf16 %v801_v36, %v800_v43  ;;  %1427 = vst [vmem:[%s2844_s20 + $0x48] sm:$0xff] %v801_v36  ;;  %1837 = vmatprep.subr.bf16.mxu1 %v2063_v34 }
 0x2ae   : > { %v2130_v40 = vpop.eup %2129  ;;  %v804_v0 = vmul.f32 %v2128_v49, %v2797_v52 }
 0x2af   : > { %1823 = vmatprep.mubr.bf16.mxu1 %v812_v31  ;;  %v803_v41 = vmul.f32 %v2130_v40, %v2795_v33 }
 0x2b0   : > { %1430 = vst [vmem:[%s2844_s20 + $0x60] sm:$0xff] %v804_v0  ;;  %1838 = vmatpush3.bf16.msra.mxu1 %v2063_v34 }
 0x2b1   : > { %v2132_v50 = vpop.eup %2131  ;;  %v813_v51 = vpack.c.bf16 %v803_v41, %v802_v18  ;;  %1429 = vst [vmem:[%s2844_s20 + $0x58] sm:$0xff] %v803_v41  ;;  %1839 = vmatprep.subr.bf16.mxu1 %v2065_v39 }
 0x2b2   : > { %v2134_v24 = vpop.eup %2133  ;;  %v806_v44 = vmul.f32 %v2132_v50, %v2801_v54  ;;  %v2071_v54 = vld [vmem:[#allocation7] sm:$0xff]  }
 0x2b3   : > { %1824 = vmatmul.mubr.bf16.gmra.mxu1 %v813_v51  ;;  %v805_v47 = vmul.f32 %v2134_v24, %v2803_v56  ;;  %v2882_v56 = vld [vmem:[#allocation5] sm:$0xff]  }
 0x2b4   : > { %1432 = vst [vmem:[%s2844_s20 + $0x70] sm:$0xff] %v806_v44  ;;  %1840 = vmatpush3.bf16.msra.mxu1 %v2065_v39  ;;  %1877 = vmatprep.subr.bf16.mxu0 %v2882_v56 }
 0x2b5   : > { %v2136_v52 = vpop.eup %2135  ;;  %v814_v16 = vpack.c.bf16 %v805_v47, %v804_v0  ;;  %1431 = vst [vmem:[%s2844_s20 + $0x68] sm:$0xff] %v805_v47  ;;  %1841 = vmatprep.subr.bf16.mxu1 %v2067_v42  ;;  %1878 = vmatpush3.bf16.msra.mxu0 %v2882_v56 }
 0x2b6   : > { %v807_v33 = vmul.f32 %v2136_v52, %v2807_v53  ;;  %v913_v53 = vpack.c.bf16 %v2657_v4, %v2654_v3  ;;  %v2410_v3 = vmov 0   ;;  %v1291_v4 = vld [vmem:[%s2901_s24 + $0x8] sm:$0xff] }
 0x2b7   : > { %1827 = vmatprep.mubr.bf16.mxu1 %v814_v16  ;;  %2048 = vset.pattern.permute.xlu1 %v2410_v3 }
 0x2b8   : > { %v815_v48 = vpack.c.bf16 %v807_v33, %v806_v44  ;;  %1433 = vst [vmem:[%s2844_s20 + $0x78] sm:$0xff] %v807_v33  ;;  %1842 = vmatpush3.bf16.msra.mxu1 %v2067_v42  ;;  %1879 = vmatprep.mubr.bf16.mxu0 %v913_v53 }
 0x2b9   : > { %1843 = vmatprep.subr.bf16.mxu1 %v2069_v21  ;;  %1880 = vmatmul.mubr.bf16.vlgmr.msra.gmra.mxu0 %v914_v10  ;;  %v1299_v10 = vld [vmem:[%s2901_s24 + $0x48] sm:$0xff] }
 0x2ba   : > { %1883 = vmatprep.mubr.bf16.mxu0 %v915_v5  ;;  %2047 = vset.pattern.permute.xlu0 %v2410_v3 }
 0x2bb   : > { %1828 = vmatmul.mubr.bf16.gmra.mxu1 %v815_v48  ;;  %1313 = vperm.xlu1 %2048, %v1291_v4  }
 0x2bc   : > { %1844 = vmatpush3.bf16.msra.mxu1 %v2069_v21  ;;  %1308 = vperm.xlu0 %2047, %v1290_v8  }
 0x2bd   : > { %1845 = vmatprep.subr.bf16.mxu1 %v2071_v54 }
 0x2bf   : > { %1318 = vperm.xlu1 %2048, %v1292_v7  }
 0x2c0   : > { %1846 = vmatpush3.bf16.msra.mxu1 %v2071_v54  ;;  %1353 = vperm.xlu0 %2047, %v1299_v10  }
 0x2c1   : > { %1895 = vmatprep.subr.bf16.mxu1 %v2812_v58  ;;  %1884 = vmatmul.mubr.bf16.gmra.mxu0 %v916_v6 }
 0x2c3   : > { %1323 = vperm.xlu1 %2048, %v1293_v19  }
 0x2c4   : > { %1363 = vperm.xlu0 %2047, %v1301_v20  }
 0x2c7   : > { %1328 = vperm.xlu1 %2048, %v1294_v27  }
 0x2c8   : > { %1373 = vperm.xlu0 %2047, %v1303_v28  }
 0x2cb   : > { %1333 = vperm.xlu1 %2048, %v1295_v62  }
 0x2cc   : > { %1383 = vperm.xlu0 %2047, %v1305_v17  }
 0x2cf   : > { %1338 = vperm.xlu1 %2048, %v1296_v14  }
 0x2d3   : > { %1343 = vperm.xlu1 %2048, %v1297_v1  }
 0x2d7   : > { %1348 = vperm.xlu1 %2048, %v1298_v26  }
 0x2db   : > { %1358 = vperm.xlu1 %2048, %v1300_v2  }
 0x2df   : > { %1368 = vperm.xlu1 %2048, %v1302_v22  }
 0x2e3   : > { %1378 = vperm.xlu1 %2048, %v1304_v9  }
 0x362   : > { %v1817_v43 = vpop.f32.mrf.mxu1 }
 0x364   : > { %v850_v23 = vpop.f32.mrf.mxu1 }
 0x366   : > { %v1818_v11 = vpop.f32.mrf.mxu1 }
 0x367   : > { %v938_v34 = vpack.c.bf16 %v1818_v11, %v1817_v43 }
 0x368   : > { %v853_v55 = vpop.f32.mrf.mxu1 }
 0x369   : > { %v937_v25 = vpack.c.bf16 %v853_v55, %v850_v23 }
 0x36b   : > { %v1821_v35 = vpop.f32.mrf.mxu1  ;;  %1847 = vmatprep.mubr.bf16.mxu1 %v937_v25 }
 0x36c   : > { %1848 = vmatmul.mubr.bf16.vlgmr.msra.gmra.mxu1 %v938_v34 }
 0x36d   : > { %v866_v18 = vpop.f32.mrf.mxu1  ;;  %1903 = vmatpush3.bf16.msra.mxu1 %v2812_v58 }
 0x36e   : > { %1896 = vmatprep.subr.bf16.mxu1 %v2814_v60 }
 0x36f   : > { %v1822_v36 = vpop.f32.mrf.mxu1 }
 0x370   : > { %v940_v39 = vpack.c.bf16 %v1822_v36, %v1821_v35 }
 0x371   : > { %v869_v49 = vpop.f32.mrf.mxu1  ;;  %1904 = vmatpush3.bf16.msra.mxu1 %v2814_v60 }
 0x372   : > { %v939_v31 = vpack.c.bf16 %v869_v49, %v866_v18  ;;  %1897 = vmatprep.subr.bf16.mxu1 %v2820_v61 }
 0x373   : > { %v1825_v40 = vpop.f32.mrf.mxu1 }
 0x374   : > { %1851 = vmatprep.mubr.bf16.mxu1 %v939_v31 }
 0x375   : > { %v882_v0 = vpop.f32.mrf.mxu1  ;;  %1852 = vmatmul.mubr.bf16.gmra.mxu1 %v940_v39 }
 0x376   : > { %1905 = vmatpush3.bf16.msra.mxu1 %v2820_v61 }
 0x377   : > { %v1826_v41 = vpop.f32.mrf.mxu1  ;;  %1898 = vmatprep.subr.bf16.mxu1 %v2824_v57 }
 0x378   : > { %v942_v51 = vpack.c.bf16 %v1826_v41, %v1825_v40 }
 0x379   : > { %v885_v58 = vpop.f32.mrf.mxu1 }
 0x37a   : > { %v941_v50 = vpack.c.bf16 %v885_v58, %v882_v0  ;;  %1906 = vmatpush3.bf16.msra.mxu1 %v2824_v57  ;;  %v917_v57 = vpack.c.bf16 %v2702_v30, %v2699_v29  ;;  %v920_v29 = vpack.c.bf16 %v2722_v46, %v2719_v45 }
 0x37b   : > { %v1829_v42 = vpop.f32.mrf.mxu1  ;;  %1899 = vmatprep.subr.bf16.mxu1 %v2828_v63 }
 0x37c   : > { %1855 = vmatprep.mubr.bf16.mxu1 %v941_v50 }
 0x37d   : > { %v898_v60 = vpop.f32.mrf.mxu1  ;;  %1856 = vmatmul.mubr.bf16.gmra.mxu1 %v942_v51 }
 0x37e   : > { %1907 = vmatpush3.bf16.msra.mxu1 %v2828_v63  ;;  %v919_v63 = vpack.c.bf16 %v2712_v38, %v2709_v37 }
 0x37f   : > { %v1830_v24 = vpop.f32.mrf.mxu1  ;;  %1900 = vmatprep.subr.bf16.mxu1 %v2832_v59 }
 0x380   : > { %v944_v47 = vpack.c.bf16 %v1830_v24, %v1829_v42 }
 0x381   : > { %v901_v61 = vpop.f32.mrf.mxu1 }
 0x382   : > { %v943_v44 = vpack.c.bf16 %v901_v61, %v898_v60  ;;  %1908 = vmatpush3.bf16.msra.mxu1 %v2832_v59 }
 0x383   : > { %1901 = vmatprep.subr.bf16.mxu1 %v2878_v32 }
 0x384   : > { %1859 = vmatprep.mubr.bf16.mxu1 %v943_v44 }
 0x385   : > { %1860 = vmatmul.mubr.bf16.gmra.mxu1 %v944_v47 }
 0x386   : > { %1909 = vmatpush3.bf16.msra.mxu1 %v2878_v32  ;;  %1887 = vmatprep.mubr.bf16.mxu1 %v917_v57 }
 0x387   : > { %1902 = vmatprep.subr.bf16.mxu1 %v2882_v56 }
 0x38a   : > { %1910 = vmatpush3.bf16.msra.mxu1 %v2882_v56 }
 0x38d   : > { %1888 = vmatmul.mubr.bf16.vlgmr.msra.gmra.mxu1 %v918_v15 }
 0x38e   : > { %1891 = vmatprep.mubr.bf16.mxu1 %v919_v63 }
 0x395   : > { %1892 = vmatmul.mubr.bf16.gmra.mxu1 %v920_v29 }
 0x396   : > { %2262 = shalt.err (!%p2259_p4)
}
 0x397   : > { %s2263_s20 = scalar_lea.hbm %s2953_s14, 2048  ;;  %s2267_s24 = scalar_lea.hbm %s3140_s19, 12288 }
 0x398   : > { %p2264_p13 = scmp.ne.s32.totalorder %s2953_s14, %s2263_s20  ;;  %p2268_p6 = scmp.lt.s32.totalorder %s2953_s14, %s3140_s19 }
 0x399   : > { %p2269_p9 = scmp.lt.s32.totalorder %s2267_s24, %s2263_s20 }
 0x39a   : > { %p2265_p8 = pnand %p2264_p13, %p2526_p7 }
 0x39b   : > { %p2270_p11 = por %p2269_p9, %p2268_p6 }
 0x39c   : > { %p2266_p10 = pneg %p2265_p8 }
 0x39e   : > { %p2271_p1 = pnand %p2270_p11, %p2266_p10 }
 0x3a0   : > { %2274 = shalt.err (!%p2271_p1)
}
 0x3a1   : > { %s2412_s17 = smov 128   ;;  %s2413_s13 = smov 8   ;;  %v1881_v12 = vpop.f32.mrf.mxu0  ;;  %v1314_v30 = vpop.permute.xlu1 %1313 }
 0x3a2   : > { %1925 = dma.vmem_to_hbm [thread:$0]  (%p2526_p7), %s2956_s30, 2048, %s2953_s14, %s1440_s12, %s2412_s17, %s2412_s17, %s2413_s13   ;;  %v1309_v11 = vpop.permute.xlu0 %1308 }
 0x3a3   : > { %v1188_v13 = vpop.f32.mrf.mxu0  ;;  %s3141_s15 = sld [smem:[#allocation23_spill]]  ;;  %s2999_s14 = scalar_lea.vmem [#allocation8], %s1663_s4 }
 0x3a4   : > { %s1455_s4 = sshll.u32 %s2999_s14, 4  ;;  %s3142_s20 = sld [smem:[#allocation24_spill]]  ;;  %s3032_s4 = int_to_ptr.vmem [resolvable:$true] %s1455_s4 }
 0x3a5   : > { %v1882_v15 = vpop.f32.mrf.mxu0  ;;  %v1319_v38 = vpop.permute.xlu1 %1318  ;;  %s1435_s21 = scalar_lea.sflag [#allocation4], %s2838_s3  ;;  %s2275_s24 = scalar_lea.vmem %s3032_s4, 2048 }
 0x3a6   : > { %p2276_p3 = scmp.ne.s32.totalorder %s3032_s4, %s2275_s24  ;;  %s2414_s23 = smov [#allocation8]  }
 0x3a7   : > { %v1191_v37 = vpop.f32.mrf.mxu0  ;;  %s2279_s27 = sshll.u32 %s2414_s23, 4  ;;  %s2280_s27 = int_to_ptr.vmem [resolvable:$false] %s2279_s27 }
 0x3a8   : > { %p2277_p5 = pnand %p2276_p3, %p2526_p7  ;;  %s2281_s16 = scalar_lea.vmem %s2280_s27, 4096 }
 0x3a9   : > { %v2987_v46 = vld [vmem:[%s3141_s15] ss:$0 sm:$0xff]  ;;  %v1885_v52 = vpop.f32.mrf.mxu0  ;;  %v1324_v53 = vpop.permute.xlu1 %1323  ;;  %p2282_p0 = scmp.lt.s32.totalorder %s3032_s4, %s2280_s27  ;;  %p2283_p2 = scmp.lt.s32.totalorder %s2281_s16, %s2275_s24 }
 0x3aa   : > { %s3029_s7 = scalar_lea.hbm %s3142_s20, %s1697_s6  ;;  %p2278_p12 = pneg %p2277_p5 }
 0x3ab   : > { %v1204_v56 = vpop.f32.mrf.mxu0  ;;  %p2284_p4 = por %p2283_p2, %p2282_p0 }
 0x3ad   : > { %v1886_v8 = vpop.f32.mrf.mxu0  ;;  %v1329_v20 = vpop.permute.xlu1 %1328  ;;  %p2285_p13 = pnand %p2284_p4, %p2278_p12 }
 0x3af   : > { %v1207_v17 = vpop.f32.mrf.mxu0 }
 0x3b1   : > { %v1334_v25 = vpop.permute.xlu1 %1333 }
 0x3b5   : > { %v1339_v0 = vpop.permute.xlu1 %1338 }
 0x3b9   : > { %v1344_v57 = vpop.permute.xlu1 %1343 }
 0x42c   : > { %v1849_v45 = vpop.f32.mrf.mxu1 }
 0x42d   : > { %v1197_v59 = vadd.f32 %v1881_v12, %v1849_v45 }
 0x42e   : > { %v1043_v16 = vpop.f32.mrf.mxu1 }
 0x42f   : > { %v1260_v33 = vadd.f32 %v2987_v46, %v1197_v59  ;;  %v1189_v48 = vadd.f32 %v1188_v13, %v1043_v16 }
 0x430   : > { %v1850_v21 = vpop.f32.mrf.mxu1 }
 0x431   : > { %2137 = vtanh.f32 %v1260_v33  ;;  %v1258_v32 = vadd.f32 %v2987_v46, %v1189_v48  ;;  %v1200_v54 = vadd.f32 %v1882_v15, %v1850_v21  ;;  %v1349_v21 = vpop.permute.xlu1 %1348 }
 0x432   : > { %v1046_v5 = vpop.f32.mrf.mxu1 }
 0x433   : > { %2139 = vtanh.f32 %v1258_v32  ;;  %v1261_v6 = vadd.f32 %v2987_v46, %v1200_v54  ;;  %v1192_v3 = vadd.f32 %v1191_v37, %v1046_v5 }
 0x435   : > { %2141 = vtanh.f32 %v1261_v6  ;;  %v1259_v4 = vadd.f32 %v2987_v46, %v1192_v3  ;;  %v1853_v7 = vpop.f32.mrf.mxu1  ;;  %v1354_v3 = vpop.permute.xlu0 %1353 }
 0x436   : > { %v1213_v10 = vadd.f32 %v1885_v52, %v1853_v7 }
 0x437   : > { %2143 = vtanh.f32 %v1259_v4  ;;  %v1059_v19 = vpop.f32.mrf.mxu1 }
 0x438   : > { %v1264_v27 = vadd.f32 %v2987_v46, %v1213_v10  ;;  %v1205_v28 = vadd.f32 %v1204_v56, %v1059_v19  ;;  %v1359_v10 = vpop.permute.xlu1 %1358 }
 0x439   : > { %v1854_v62 = vpop.f32.mrf.mxu1 }
 0x43a   : > { %2145 = vtanh.f32 %v1264_v27  ;;  %v1262_v14 = vadd.f32 %v2987_v46, %v1205_v28  ;;  %v1216_v1 = vadd.f32 %v1886_v8, %v1854_v62 }
 0x43b   : > { %v1062_v26 = vpop.f32.mrf.mxu1 }
 0x43c   : > { %2147 = vtanh.f32 %v1262_v14  ;;  %v1265_v2 = vadd.f32 %v2987_v46, %v1216_v1  ;;  %v1208_v22 = vadd.f32 %v1207_v17, %v1062_v26  ;;  %v1364_v17 = vpop.permute.xlu0 %1363  ;;  %v1369_v26 = vpop.permute.xlu1 %1368 }
 0x43d   : > { %v1857_v9 = vpop.f32.mrf.mxu1 }
 0x43e   : > { %v2138_v43 = vpop.eup %2137  ;;  %2149 = vtanh.f32 %v1265_v2  ;;  %v1263_v23 = vadd.f32 %v2987_v46, %v1208_v22 }
 0x43f   : > { %v1388_v55 = vmul.f32 %v2138_v43, %v1319_v38  ;;  %v1075_v34 = vpop.f32.mrf.mxu1 }
 0x440   : > { %v2140_v35 = vpop.eup %2139  ;;  %2151 = vtanh.f32 %v1263_v23  ;;  %v1374_v23 = vpop.permute.xlu0 %1373 }
 0x441   : > { %1404 = vst [vmem:[%s2999_s14 + $0x10] sm:$0xff] %v1388_v55  ;;  %v1386_v18 = vmul.f32 %v2140_v35, %v1309_v11  ;;  %v1858_v36 = vpop.f32.mrf.mxu1  ;;  %v1379_v55 = vpop.permute.xlu1 %1378 }
 0x442   : > { %v2142_v49 = vpop.eup %2141 }
 0x443   : > { %v1389_v31 = vmul.f32 %v2142_v49, %v1324_v53  ;;  %1402 = vst [vmem:[%s2999_s14] sm:$0xff] %v1386_v18  ;;  %v1078_v39 = vpop.f32.mrf.mxu1 }
 0x444   : > { %v2144_v40 = vpop.eup %2143 }
 0x445   : > { %1405 = vst [vmem:[%s2999_s14 + $0x18] sm:$0xff] %v1389_v31  ;;  %v1387_v41 = vmul.f32 %v2144_v40, %v1314_v30  ;;  %v1861_v58 = vpop.f32.mrf.mxu1 }
 0x447   : > { %v2146_v50 = vpop.eup %2145  ;;  %1403 = vst [vmem:[%s2999_s14 + $0x8] sm:$0xff] %v1387_v41  ;;  %v1091_v51 = vpop.f32.mrf.mxu1 }
 0x448   : > { %v1392_v42 = vmul.f32 %v2146_v50, %v1339_v0 }
 0x449   : > { %v2148_v60 = vpop.eup %2147  ;;  %v1862_v24 = vpop.f32.mrf.mxu1 }
 0x44a   : > { %1408 = vst [vmem:[%s2999_s14 + $0x30] sm:$0xff] %v1392_v42  ;;  %v1390_v61 = vmul.f32 %v2148_v60, %v1329_v20 }
 0x44b   : > { %v2150_v44 = vpop.eup %2149  ;;  %v1094_v47 = vpop.f32.mrf.mxu1 }
 0x44c   : > { %1406 = vst [vmem:[%s2999_s14 + $0x20] sm:$0xff] %v1390_v61  ;;  %v1393_v63 = vmul.f32 %v2150_v44, %v1344_v57 }
 0x44d   : > { %v2152_v29 = vpop.eup %2151  ;;  %v1889_v12 = vpop.f32.mrf.mxu1 }
 0x44e   : > { %1409 = vst [vmem:[%s2999_s14 + $0x38] sm:$0xff] %v1393_v63  ;;  %v1391_v13 = vmul.f32 %v2152_v29, %v1334_v25  ;;  %v1229_v15 = vadd.f32 %v1889_v12, %v1857_v9 }
 0x44f   : > { %v1220_v30 = vpop.f32.mrf.mxu1 }
 0x450   : > { %1407 = vst [vmem:[%s2999_s14 + $0x28] sm:$0xff] %v1391_v13  ;;  %v1268_v37 = vadd.f32 %v2987_v46, %v1229_v15  ;;  %v1221_v38 = vadd.f32 %v1220_v30, %v1075_v34 }
 0x451   : > { %v1890_v45 = vpop.f32.mrf.mxu1 }
 0x452   : > { %2153 = vtanh.f32 %v1268_v37  ;;  %v1266_v59 = vadd.f32 %v2987_v46, %v1221_v38  ;;  %v1232_v52 = vadd.f32 %v1890_v45, %v1858_v36  ;;  %v1384_v36 = vpop.permute.xlu0 %1383 }
 0x453   : > { %v1223_v16 = vpop.f32.mrf.mxu1 }
 0x454   : > { %2155 = vtanh.f32 %v1266_v59  ;;  %v1269_v33 = vadd.f32 %v2987_v46, %v1232_v52  ;;  %v1224_v48 = vadd.f32 %v1223_v16, %v1078_v39 }
 0x455   : > { %v1893_v32 = vpop.f32.mrf.mxu1 }
 0x456   : > { %2157 = vtanh.f32 %v1269_v33  ;;  %v1267_v54 = vadd.f32 %v2987_v46, %v1224_v48  ;;  %v1245_v56 = vadd.f32 %v1893_v32, %v1861_v58 }
 0x457   : > { %v1236_v53 = vpop.f32.mrf.mxu1 }
 0x458   : > { %2159 = vtanh.f32 %v1267_v54  ;;  %v1272_v5 = vadd.f32 %v2987_v46, %v1245_v56  ;;  %v1237_v6 = vadd.f32 %v1236_v53, %v1091_v51 }
 0x459   : > { %v1894_v4 = vpop.f32.mrf.mxu1 }
 0x45a   : > { %2161 = vtanh.f32 %v1272_v5  ;;  %v1270_v7 = vadd.f32 %v2987_v46, %v1237_v6  ;;  %v1248_v8 = vadd.f32 %v1894_v4, %v1862_v24 }
 0x45b   : > { %v1239_v19 = vpop.f32.mrf.mxu1 }
 0x45c   : > { %2163 = vtanh.f32 %v1270_v7  ;;  %v1273_v20 = vadd.f32 %v2987_v46, %v1248_v8  ;;  %v1240_v27 = vadd.f32 %v1239_v19, %v1094_v47 }
 0x45e   : > { %2165 = vtanh.f32 %v1273_v20  ;;  %v1271_v28 = vadd.f32 %v2987_v46, %v1240_v27 }
 0x45f   : > { %v2154_v62 = vpop.eup %2153 }
 0x460   : > { %v1396_v14 = vmul.f32 %v2154_v62, %v1359_v10  ;;  %2167 = vtanh.f32 %v1271_v28 }
 0x461   : > { %v2156_v1 = vpop.eup %2155 }
 0x462   : > { %1412 = vst [vmem:[%s2999_s14 + $0x50] sm:$0xff] %v1396_v14  ;;  %v1394_v2 = vmul.f32 %v2156_v1, %v1349_v21 }
 0x463   : > { %v2158_v22 = vpop.eup %2157 }
 0x464   : > { %1410 = vst [vmem:[%s2999_s14 + $0x40] sm:$0xff] %v1394_v2  ;;  %v1397_v9 = vmul.f32 %v2158_v22, %v1364_v17 }
 0x465   : > { %v2160_v43 = vpop.eup %2159 }
 0x466   : > { %v1395_v11 = vmul.f32 %v2160_v43, %v1354_v3  ;;  %1413 = vst [vmem:[%s2999_s14 + $0x58] sm:$0xff] %v1397_v9 }
 0x467   : > { %v2162_v46 = vpop.eup %2161 }
 0x468   : > { %1411 = vst [vmem:[%s2999_s14 + $0x48] sm:$0xff] %v1395_v11  ;;  %v1400_v25 = vmul.f32 %v2162_v46, %v1379_v55 }
 0x469   : > { %v2164_v34 = vpop.eup %2163 }
 0x46a   : > { %1416 = vst [vmem:[%s2999_s14 + $0x70] sm:$0xff] %v1400_v25  ;;  %v1398_v35 = vmul.f32 %v2164_v34, %v1369_v26 }
 0x46b   : > { %v2166_v18 = vpop.eup %2165 }
 0x46c   : > { %1414 = vst [vmem:[%s2999_s14 + $0x60] sm:$0xff] %v1398_v35  ;;  %v1401_v49 = vmul.f32 %v2166_v18, %v1384_v36 }
 0x46d   : > { %v2168_v31 = vpop.eup %2167 }
 0x46e   : > { %v1399_v39 = vmul.f32 %v2168_v31, %v1374_v23  ;;  %1417 = vst [vmem:[%s2999_s14 + $0x78] sm:$0xff] %v1401_v49 }
 0x470   : > { %1415 = vst [vmem:[%s2999_s14 + $0x68] sm:$0xff] %v1399_v39 }
 0x471   : > { %2288 = shalt.err (!%p2285_p13)
}
 0x472   : > { %s2289_s6 = scalar_lea.hbm %s3029_s7, 2048  ;;  %s2293_s2 = scalar_lea.hbm %s3142_s20, 12288 }
 0x473   : > { %p2290_p8 = scmp.ne.s32.totalorder %s3029_s7, %s2289_s6  ;;  %p2294_p9 = scmp.lt.s32.totalorder %s3029_s7, %s3142_s20 }
 0x474   : > { %p2295_p11 = scmp.lt.s32.totalorder %s2293_s2, %s2289_s6 }
 0x475   : > { %p2291_p10 = pnand %p2290_p8, %p2526_p7 }
 0x476   : > { %p2296_p1 = por %p2295_p11, %p2294_p9 }
 0x477   : > { %p2292_p6 = pneg %p2291_p10 }
 0x479   : > { %p2297_p3 = pnand %p2296_p1, %p2292_p6 }
 0x47b   : > { %2300 = shalt.err (!%p2297_p3)
}
 0x47c   : > { %1924 = dma.vmem_to_hbm [thread:$0]  (%p2526_p7), %s3032_s4, 2048, %s3029_s7, %s1435_s21, %s2412_s17, %s2412_s17, %s2413_s13  }
 0x47d PF: > { %s3143_s30 = sld [smem:[#allocation15_spill]]  ;;  %p1951_p5 = scmp.ge.s32.totalorder %s2403_s11, 2 }
 0x47e   : > { %s3144_s12 = sld [smem:[#allocation18_spill]] }
 0x483   : > { %s1488_s24 = sand.u32 1, %s3143_s30  }
 0x484   : > { %p3145_p12 = scmp.ne.s32.totalorder %s3144_s12, 0  ;;  %s1489_s23 = scalar_lea.sflag [#allocation4], %s1488_s24 }
 0x486   : > { %p1940_p0 = pnand %p1951_p5, %p3145_p12 }
 0x488   : > { %p1941_p2 = pneg %p1940_p0 }
 0x48a   : > { %2354 = dma.done.wait (%p1941_p2), %s1489_s23, 2048  }
 0x48b   : > { %2356 = vsyncadd (%p1941_p2), %s1489_s23, 4294965248  ;;  %s1498_s27 = scalar_lea.sflag [#allocation10], %s1488_s24 }
 0x48c   : > { %2358 = dma.done.wait (%p1941_p2), %s1498_s27, 2048  }
 0x48d   : > { %2360 = vsyncadd (%p1941_p2), %s1498_s27, 4294965248  ;;  %s28_s11 = sadd.s32 1, %s2403_s11   ;;  %s3146_s30 = sld [smem:[#allocation16_spill]] }
 0x48e   : > { %p25_p4 = scmp.ge.s32.totalorder %s28_s11, 8   ;;  %s3147_s22 = sld [smem:[#allocation19_spill]] }
 0x48f   : > { %s3148_s24 = smov %s2367_s25  ;;  %s3149_s25 = smov %s2371_s26 }
 0x490   : > { %s3150_s26 = smov %s2603_s9  ;;  %s3151_s27 = smov %s2379_s28 }
 0x491   : > { %s3152_s28 = smov %s2383_s29  ;;  %s3153_s29 = smov %s2598_s5 }
 0x492   : > { %s3154_s8 = smov %s2399_s10  ;;  %s3156_s10 = smov %s3162_s18 }
 0x493   :  { %27 = sbr.rel (!%p25_p4) target bundleno = 19 (0x13), region = 120 }
 0x494   : > { %s3155_s9 = smov %s3147_s22 }
 0x498   :  { %1503 = vsyncpa [#allocation3], 1 }
 0x499   :  { %1505 = vsyncpa [#allocation3 + $0x1], 1 }
 0x49a   :  { %1506 = vsyncpa [#allocation6], 1 }
 0x49b   :  { %1507 = vsyncpa [#allocation4], 1 }
 0x49c   :  { %1509 = vsyncpa [#allocation4 + $0x1], 1 }
 0x49d   :  { %1510 = vsyncpa [#allocation10], 1 }
 0x49e   :  { %1512 = vsyncpa [#allocation10 + $0x1], 1 }

</bundles_post_ra>
